<compile_context>
chip_gen: v7x
topology: tpu7x:2x2x1
jax: 0.10.0
libtpu: 0.0.40
codegen_flags: <defaults>
</compile_context>

<pallas_src>
import numpy as np
import jax
import jax.numpy as jnp
from jax.experimental import pallas as pl
from jax.experimental.pallas import tpu as pltpu


# ----------------------------------------------------------------------------
# Fused Pallas kernel: LRASPPHead + final trilinear resize
# ----------------------------------------------------------------------------

def lraspp_fused_kernel(high_ref, low_ref, w_cbr_ref, bn_scale_ref,
                        bn_shift_ref, w_scale_ref, w_low_ref, b_low_ref,
                        w_high_ref, b_high_ref, m_final_ref, m_comb_ref,
                        out_ref):
    """All tensors are channel-major: activations [C, S], weights [C_out, C_in],
    interpolation operators transposed [S_in, S_out]."""
    f32 = jnp.float32
    bf16 = jnp.bfloat16

    high = high_ref[0]                                        # [C_high, S_h] bf16
    low = low_ref[0]                                          # [C_low,  S_l] bf16

    # --- cbr branch: 1x1 conv (matmul) + eval-mode BN + ReLU -> [C_inter, S_h]
    x = jnp.dot(w_cbr_ref[...], high, preferred_element_type=f32)
    x = x * bn_scale_ref[...] + bn_shift_ref[...]
    x = jnp.maximum(x, 0.0)

    # --- scale branch: global avg pool + 1x1 conv + sigmoid -> [C_inter, 1]
    # mean_S(w_scale @ high) == w_scale @ mean_S(high)  (linear reorder)
    t = jnp.dot(w_scale_ref[...], high, preferred_element_type=f32)
    s = jax.nn.sigmoid(jnp.mean(t, axis=1, keepdims=True))

    y = x * s                                                 # gated, [C_inter, S_h]

    # --- classifiers applied BEFORE upsampling (associativity reorder)
    hi = jnp.dot(w_high_ref[...], y.astype(bf16),
                 preferred_element_type=f32) + b_high_ref[...]   # [K, S_h]
    lo = jnp.dot(w_low_ref[...], low,
                 preferred_element_type=f32) + b_low_ref[...]    # [K, S_l]

    # --- fused trilinear upsampling:
    #     out = m_final @ lo_cl + (m_final @ m_up) @ hi_cl, written as [K, S_f]
    out = jnp.dot(lo.astype(bf16), m_final_ref[...],
                  preferred_element_type=f32)
    out = out + jnp.dot(hi.astype(bf16), m_comb_ref[...],
                        preferred_element_type=f32)
    out_ref[0] = out.astype(out_ref.dtype)                    # [K, S_f] lane-dense


def lraspp_head_fused_pallas(high_cs, low_cs, m_final_t, m_comb_t, params):
    """high_cs: [N, C_high, S_h], low_cs: [N, C_low, S_l] (float32).
    Returns [N, K, S_f] float32."""
    N, Ch, Sh = high_cs.shape
    _, Cl, Sl = low_cs.shape
    Sf = m_final_t.shape[1]
    Ci = params["w_cbr"].shape[1]
    K = params["w_low_cls"].shape[1]
    bf16 = jnp.bfloat16

    # kernel-facing transposed ([C_out, C_in]) bf16 weights; f32 BN / biases.
    w_cbr_t = params["w_cbr"].T.astype(bf16)            # [Ci, Ch]
    w_scale_t = params["w_scale"].T.astype(bf16)        # [Ci, Ch]
    w_low_t = params["w_low_cls"].T.astype(bf16)        # [K, Cl]
    w_high_t = params["w_high_cls"].T.astype(bf16)      # [K, Ci]
    bn_scale = params["bn_scale"].reshape(Ci, 1)
    bn_shift = params["bn_shift"].reshape(Ci, 1)
    b_low = params["b_low_cls"].reshape(K, 1)
    b_high = params["b_high_cls"].reshape(K, 1)

    return pl.pallas_call(
        lraspp_fused_kernel,
        out_shape=jax.ShapeDtypeStruct((N, K, Sf), jnp.float32),
        grid=(N,),
        in_specs=[
            pl.BlockSpec((1, Ch, Sh), lambda n: (n, 0, 0)),
            pl.BlockSpec((1, Cl, Sl), lambda n: (n, 0, 0)),
            pl.BlockSpec((Ci, Ch), lambda n: (0, 0)),
            pl.BlockSpec((Ci, 1), lambda n: (0, 0)),
            pl.BlockSpec((Ci, 1), lambda n: (0, 0)),
            pl.BlockSpec((Ci, Ch), lambda n: (0, 0)),
            pl.BlockSpec((K, Cl), lambda n: (0, 0)),
            pl.BlockSpec((K, 1), lambda n: (0, 0)),
            pl.BlockSpec((K, Ci), lambda n: (0, 0)),
            pl.BlockSpec((K, 1), lambda n: (0, 0)),
            pl.BlockSpec((Sl, Sf), lambda n: (0, 0)),
            pl.BlockSpec((Sh, Sf), lambda n: (0, 0)),
        ],
        out_specs=pl.BlockSpec((1, K, Sf), lambda n: (n, 0, 0)),
        compiler_params=pltpu.CompilerParams(
            dimension_semantics=("parallel",),
            vmem_limit_bytes=64 * 1024 * 1024),
    )(high_cs.astype(bf16), low_cs.astype(bf16),
      w_cbr_t, bn_scale, bn_shift, w_scale_t,
      w_low_t, b_low, w_high_t, b_high,
      m_final_t, m_comb_t)


# ----------------------------------------------------------------------------
# Glue: interpolation matrices, layout helpers, synthetic backbone
# ----------------------------------------------------------------------------

def linear_interp_matrix_1d(out_size, in_size):
    """PyTorch 'linear, align_corners=False' interpolation as a matrix (f64)."""
    i = np.arange(out_size, dtype=np.float64)
    scale = in_size / out_size
    src = (i + 0.5) * scale - 0.5
    src = np.clip(src, 0.0, None)
    i0 = np.minimum(np.floor(src).astype(np.int64), in_size - 1)
    i1 = np.minimum(i0 + 1, in_size - 1)
    w1 = src - i0
    w0 = 1.0 - w1
    m = np.zeros((out_size, in_size), dtype=np.float64)
    m[np.arange(out_size), i0] += w0
    m[np.arange(out_size), i1] += w1
    return m


def trilinear_interp_matrix_np(out_dhw, in_dhw):
    md = linear_interp_matrix_1d(out_dhw[0], in_dhw[0])
    mh = linear_interp_matrix_1d(out_dhw[1], in_dhw[1])
    mw = linear_interp_matrix_1d(out_dhw[2], in_dhw[2])
    return np.kron(np.kron(md, mh), mw)                       # [S_out, S_in] f64


def ncdhw_to_flat(x):
    # [N, C, D, H, W] -> [N, S, C]   (reference only)
    n, c, d, h, w = x.shape
    return jnp.transpose(x, (0, 2, 3, 4, 1)).reshape(n, d * h * w, c)


def flat_to_ncdhw(x, dhw):
    n, s, c = x.shape
    d, h, w = dhw
    return jnp.transpose(x.reshape(n, d, h, w, c), (0, 4, 1, 2, 3))


def avg_pool3d(x, k):
    n, c, d, h, w = x.shape
    x = x.reshape(n, c, d // k, k, h // k, k, w // k, k)
    return x.mean(axis=(3, 5, 7))


def synthetic_backbone(x, w_bb_low, w_bb_high):
    """Deterministic stand-in for the external backbone argument of LRASPP.
    Returns {'low': stride-2 features, 'high': stride-4 features}."""
    p2 = avg_pool3d(x, 2)  # [N, Cin, D/2, H/2, W/2]
    p4 = avg_pool3d(x, 4)  # [N, Cin, D/4, H/4, W/4]
    low = jax.nn.relu(jnp.einsum("ncdhw,co->nodhw", p2, w_bb_low))
    high = jax.nn.relu(jnp.einsum("ncdhw,co->nodhw", p4, w_bb_high))
    return {"low": low, "high": high}


# ----------------------------------------------------------------------------
# Full LRASPP forward (single fused Pallas kernel for the hot path)
# ----------------------------------------------------------------------------

def lraspp_forward(x, params):
    n, _, d, h, w = x.shape
    feats = synthetic_backbone(x, params["w_bb_low"], params["w_bb_high"])
    low, high = feats["low"], feats["high"]                    # NCDHW
    low_dhw, high_dhw = low.shape[-3:], high.shape[-3:]
    final_dhw = (int(d / 1.5), int(h / 1.5), int(w / 1.5))

    # channel-major, spatially flattened: [N, C, S] (pure reshape, no transpose)
    low_cs = low.reshape(n, low.shape[1], -1)
    high_cs = high.reshape(n, high.shape[1], -1)

    # host-precomputed interpolation operators (f64 -> bf16), transposed so the
    # kernel right-multiplies: [K, S_in] @ [S_in, S_out]  (S_out on lanes).
    m_up = trilinear_interp_matrix_np(low_dhw, high_dhw)       # [S_l, S_h]
    m_final = trilinear_interp_matrix_np(final_dhw, low_dhw)   # [S_f, S_l]
    m_comb = m_final @ m_up                                    # [S_f, S_h]
    m_final_t = jnp.asarray(m_final.T, dtype=jnp.bfloat16)     # [S_l, S_f]
    m_comb_t = jnp.asarray(m_comb.T, dtype=jnp.bfloat16)       # [S_h, S_f]

    out_ks = lraspp_head_fused_pallas(high_cs, low_cs, m_final_t, m_comb_t,
                                      params)                  # [N, K, S_f]
    return out_ks.reshape(n, out_ks.shape[1], *final_dhw)      # NCDHW


def lraspp_reference(x, params):
    """Pure-JAX f32 reference with the original (unfused) math."""
    n, _, d, h, w = x.shape
    feats = synthetic_backbone(x, params["w_bb_low"], params["w_bb_high"])
    low, high = feats["low"], feats["high"]
    low_dhw, high_dhw = low.shape[-3:], high.shape[-3:]
    final_dhw = (int(d / 1.5), int(h / 1.5), int(w / 1.5))
    low_flat, high_flat = ncdhw_to_flat(low), ncdhw_to_flat(high)
    m_up = jnp.asarray(trilinear_interp_matrix_np(low_dhw, high_dhw),
                       dtype=jnp.float32)
    m_final = jnp.asarray(trilinear_interp_matrix_np(final_dhw, low_dhw),
                          dtype=jnp.float32)

    xh = jnp.maximum(high_flat @ params["w_cbr"] * params["bn_scale"]
                     + params["bn_shift"], 0.0)
    s = jax.nn.sigmoid(jnp.mean(high_flat, axis=1, keepdims=True)
                       @ params["w_scale"])
    y = xh * s
    x_up = jnp.einsum("os,nsc->noc", m_up, y)
    out = (low_flat @ params["w_low_cls"] + params["b_low_cls"]
           + x_up @ params["w_high_cls"] + params["b_high_cls"])
    out_f = jnp.einsum("os,nsc->noc", m_final, out)
    return flat_to_ncdhw(out_f, final_dhw)


# ----------------------------------------------------------------------------
# Deterministic parameter construction
# ----------------------------------------------------------------------------

def make_params(in_ch, low_ch, high_ch, num_classes, inter_ch):
    keys = jax.random.split(jax.random.PRNGKey(0), 12)
    f32 = jnp.float32

    def nrm(k, shape, scale=0.1):
        return scale * jax.random.normal(k, shape, dtype=f32)

    # eval-mode BatchNorm folded to scale/shift
    gamma = 0.5 + jax.random.uniform(keys[0], (1, inter_ch), dtype=f32)
    beta = nrm(keys[1], (1, inter_ch))
    run_mean = nrm(keys[2], (1, inter_ch))
    run_var = 0.5 + jax.random.uniform(keys[3], (1, inter_ch), dtype=f32)
    eps = 1e-5
    bn_scale = gamma / jnp.sqrt(run_var + eps)
    bn_shift = beta - run_mean * bn_scale

    return {
        # synthetic backbone
        "w_bb_low": nrm(keys[4], (in_ch, low_ch)),
        "w_bb_high": nrm(keys[5], (in_ch, high_ch)),
        # LRASPPHead
        "w_cbr": nrm(keys[6], (high_ch, inter_ch)),      # Conv3d 1x1, no bias
        "bn_scale": bn_scale,
        "bn_shift": bn_shift,
        "w_scale": nrm(keys[7], (high_ch, inter_ch)),    # Conv3d 1x1, no bias
        "w_low_cls": nrm(keys[8], (low_ch, num_classes)),
        "b_low_cls": nrm(keys[9], (1, num_classes)),
        "w_high_cls": nrm(keys[10], (inter_ch, num_classes)),
        "b_high_cls": nrm(keys[11], (1, num_classes)),
    }


if __name__ == "__main__":
    N, C_IN, D, H, W = 2, 4, 16, 16, 16
    LOW_CH, HIGH_CH, NUM_CLASSES, INTER_CH = 8, 32, 5, 16

    params = make_params(C_IN, LOW_CH, HIGH_CH, NUM_CLASSES, INTER_CH)
    x = jax.random.normal(jax.random.PRNGKey(0), (N, C_IN, D, H, W),
                          dtype=jnp.float32)

    out = lraspp_forward(x, params)
    out = jax.block_until_ready(out)

    ref = jax.block_until_ready(lraspp_reference(x, params))
    expected_shape = (N, NUM_CLASSES, int(D / 1.5), int(H / 1.5), int(W / 1.5))
    assert out.shape == expected_shape, (out.shape, expected_shape)
    # bf16 operands (f32 accumulation) in the kernel vs f32 reference.
    np.testing.assert_allclose(np.asarray(out), np.asarray(ref),
                               rtol=2e-2, atol=2e-2)
    print("KERNEL_OK")
</pallas_src>

<mosaic_0001>
module attributes {stable_mosaic.version = 11 : i64} {
  func.func @lraspp_fused_kernel(%arg0: i32, %arg1: memref<1x32x64xbf16, #tpu.memory_space<vmem>>, %arg2: memref<1x8x512xbf16, #tpu.memory_space<vmem>>, %arg3: memref<16x32xbf16, #tpu.memory_space<vmem>>, %arg4: memref<16x1xf32, #tpu.memory_space<vmem>>, %arg5: memref<16x1xf32, #tpu.memory_space<vmem>>, %arg6: memref<16x32xbf16, #tpu.memory_space<vmem>>, %arg7: memref<5x8xbf16, #tpu.memory_space<vmem>>, %arg8: memref<5x1xf32, #tpu.memory_space<vmem>>, %arg9: memref<5x16xbf16, #tpu.memory_space<vmem>>, %arg10: memref<5x1xf32, #tpu.memory_space<vmem>>, %arg11: memref<512x1000xbf16, #tpu.memory_space<vmem>>, %arg12: memref<64x1000xbf16, #tpu.memory_space<vmem>>, %arg13: memref<1x5x1000xf32, #tpu.memory_space<vmem>>) attributes {dimension_semantics = [#tpu.dimension_semantics<parallel>], iteration_bounds = array<i64: 2>, scalar_prefetch = 0 : i64, scratch_operands = 0 : i64, tpu.core_type = #tpu.core_type<tc>, window_params = [{transform_indices = @transform_0, window_bounds = array<i64: 1, 32, 64>}, {transform_indices = @transform_1, window_bounds = array<i64: 1, 8, 512>}, {pipeline_mode = #tpu.pipeline_mode<synchronous>, transform_indices = @transform_2, window_bounds = array<i64: 16, 32>}, {pipeline_mode = #tpu.pipeline_mode<synchronous>, transform_indices = @transform_3, window_bounds = array<i64: 16, 1>}, {pipeline_mode = #tpu.pipeline_mode<synchronous>, transform_indices = @transform_4, window_bounds = array<i64: 16, 1>}, {pipeline_mode = #tpu.pipeline_mode<synchronous>, transform_indices = @transform_5, window_bounds = array<i64: 16, 32>}, {pipeline_mode = #tpu.pipeline_mode<synchronous>, transform_indices = @transform_6, window_bounds = array<i64: 5, 8>}, {pipeline_mode = #tpu.pipeline_mode<synchronous>, transform_indices = @transform_7, window_bounds = array<i64: 5, 1>}, {pipeline_mode = #tpu.pipeline_mode<synchronous>, transform_indices = @transform_8, window_bounds = array<i64: 5, 16>}, {pipeline_mode = #tpu.pipeline_mode<synchronous>, transform_indices = @transform_9, window_bounds = array<i64: 5, 1>}, {pipeline_mode = #tpu.pipeline_mode<synchronous>, transform_indices = @transform_10, window_bounds = array<i64: 512, 1000>}, {pipeline_mode = #tpu.pipeline_mode<synchronous>, transform_indices = @transform_11, window_bounds = array<i64: 64, 1000>}, {transform_indices = @transform_12, window_bounds = array<i64: 1, 5, 1000>}]} {
    %c0 = arith.constant 0 : index
    %c0_0 = arith.constant 0 : index
    %c0_1 = arith.constant 0 : index
    %0 = vector.load %arg1[%c0, %c0_0, %c0_1] : memref<1x32x64xbf16, #tpu.memory_space<vmem>>, vector<1x32x64xbf16>
    %1 = vector.shape_cast %0 : vector<1x32x64xbf16> to vector<32x64xbf16>
    %c0_2 = arith.constant 0 : index
    %c0_3 = arith.constant 0 : index
    %c0_4 = arith.constant 0 : index
    %2 = vector.load %arg2[%c0_2, %c0_3, %c0_4] : memref<1x8x512xbf16, #tpu.memory_space<vmem>>, vector<1x8x512xbf16>
    %3 = vector.shape_cast %2 : vector<1x8x512xbf16> to vector<8x512xbf16>
    %c0_5 = arith.constant 0 : index
    %c0_6 = arith.constant 0 : index
    %4 = vector.load %arg3[%c0_5, %c0_6] : memref<16x32xbf16, #tpu.memory_space<vmem>>, vector<16x32xbf16>
    %cst = arith.constant dense<0.000000e+00> : vector<16x64xf32>
    %5 = tpu.matmul %4, %1, %cst {dimension_numbers = #tpu.dot_dimension_numbers<[1], [0], [0], [1], [0, 0, 1, 1], [], []>} : vector<16x32xbf16>, vector<32x64xbf16>, vector<16x64xf32> -> vector<16x64xf32>
    %c0_7 = arith.constant 0 : index
    %c0_8 = arith.constant 0 : index
    %6 = vector.load %arg4[%c0_7, %c0_8] : memref<16x1xf32, #tpu.memory_space<vmem>>, vector<16x1xf32>
    %7 = vector.broadcast %6 : vector<16x1xf32> to vector<16x64xf32>
    %8 = arith.mulf %5, %7 : vector<16x64xf32>
    %c0_9 = arith.constant 0 : index
    %c0_10 = arith.constant 0 : index
    %9 = vector.load %arg5[%c0_9, %c0_10] : memref<16x1xf32, #tpu.memory_space<vmem>>, vector<16x1xf32>
    %10 = vector.broadcast %9 : vector<16x1xf32> to vector<16x64xf32>
    %11 = arith.addf %8, %10 : vector<16x64xf32>
    %cst_11 = arith.constant 0.000000e+00 : f32
    %12 = vector.broadcast %cst_11 : f32 to vector<16x64xf32>
    %13 = arith.maximumf %11, %12 : vector<16x64xf32>
    %c0_12 = arith.constant 0 : index
    %c0_13 = arith.constant 0 : index
    %14 = vector.load %arg6[%c0_12, %c0_13] : memref<16x32xbf16, #tpu.memory_space<vmem>>, vector<16x32xbf16>
    %cst_14 = arith.constant dense<0.000000e+00> : vector<16x64xf32>
    %15 = tpu.matmul %14, %1, %cst_14 {dimension_numbers = #tpu.dot_dimension_numbers<[1], [0], [0], [1], [0, 0, 1, 1], [], []>} : vector<16x32xbf16>, vector<32x64xbf16>, vector<16x64xf32> -> vector<16x64xf32>
    %cst_15 = arith.constant dense<0.000000e+00> : vector<16xf32>
    %16 = vector.multi_reduction <add>, %15, %cst_15 [1] : vector<16x64xf32> to vector<16xf32>
    %17 = vector.shape_cast %16 : vector<16xf32> to vector<16x1xf32>
    %cst_16 = arith.constant 6.400000e+01 : f32
    %18 = vector.broadcast %cst_16 : f32 to vector<16x1xf32>
    %19 = arith.divf %17, %18 : vector<16x1xf32>
    %20 = arith.negf %19 : vector<16x1xf32>
    %21 = math.exp %20 : vector<16x1xf32>
    %cst_17 = arith.constant 1.000000e+00 : f32
    %22 = vector.broadcast %cst_17 : f32 to vector<16x1xf32>
    %23 = arith.addf %22, %21 : vector<16x1xf32>
    %24 = arith.divf %22, %23 : vector<16x1xf32>
    %25 = vector.broadcast %24 : vector<16x1xf32> to vector<16x64xf32>
    %26 = arith.mulf %13, %25 : vector<16x64xf32>
    %c0_18 = arith.constant 0 : index
    %c0_19 = arith.constant 0 : index
    %27 = vector.load %arg9[%c0_18, %c0_19] : memref<5x16xbf16, #tpu.memory_space<vmem>>, vector<5x16xbf16>
    %28 = arith.truncf %26 : vector<16x64xf32> to vector<16x64xbf16>
    %cst_20 = arith.constant dense<0.000000e+00> : vector<5x64xf32>
    %29 = tpu.matmul %27, %28, %cst_20 {dimension_numbers = #tpu.dot_dimension_numbers<[1], [0], [0], [1], [0, 0, 1, 1], [], []>} : vector<5x16xbf16>, vector<16x64xbf16>, vector<5x64xf32> -> vector<5x64xf32>
    %c0_21 = arith.constant 0 : index
    %c0_22 = arith.constant 0 : index
    %30 = vector.load %arg10[%c0_21, %c0_22] : memref<5x1xf32, #tpu.memory_space<vmem>>, vector<5x1xf32>
    %31 = vector.broadcast %30 : vector<5x1xf32> to vector<5x64xf32>
    %32 = arith.addf %29, %31 : vector<5x64xf32>
    %c0_23 = arith.constant 0 : index
    %c0_24 = arith.constant 0 : index
    %33 = vector.load %arg7[%c0_23, %c0_24] : memref<5x8xbf16, #tpu.memory_space<vmem>>, vector<5x8xbf16>
    %cst_25 = arith.constant dense<0.000000e+00> : vector<5x512xf32>
    %34 = tpu.matmul %33, %3, %cst_25 {dimension_numbers = #tpu.dot_dimension_numbers<[1], [0], [0], [1], [0, 0, 1, 1], [], []>} : vector<5x8xbf16>, vector<8x512xbf16>, vector<5x512xf32> -> vector<5x512xf32>
    %c0_26 = arith.constant 0 : index
    %c0_27 = arith.constant 0 : index
    %35 = vector.load %arg8[%c0_26, %c0_27] : memref<5x1xf32, #tpu.memory_space<vmem>>, vector<5x1xf32>
    %36 = vector.broadcast %35 : vector<5x1xf32> to vector<5x512xf32>
    %37 = arith.addf %34, %36 : vector<5x512xf32>
    %38 = arith.truncf %37 : vector<5x512xf32> to vector<5x512xbf16>
    %c0_28 = arith.constant 0 : index
    %c0_29 = arith.constant 0 : index
    %39 = vector.load %arg11[%c0_28, %c0_29] : memref<512x1000xbf16, #tpu.memory_space<vmem>>, vector<512x1000xbf16>
    %cst_30 = arith.constant dense<0.000000e+00> : vector<5x1000xf32>
    %40 = tpu.matmul %38, %39, %cst_30 {dimension_numbers = #tpu.dot_dimension_numbers<[1], [0], [0], [1], [0, 0, 1, 1], [], []>} : vector<5x512xbf16>, vector<512x1000xbf16>, vector<5x1000xf32> -> vector<5x1000xf32>
    %41 = arith.truncf %32 : vector<5x64xf32> to vector<5x64xbf16>
    %c0_31 = arith.constant 0 : index
    %c0_32 = arith.constant 0 : index
    %42 = vector.load %arg12[%c0_31, %c0_32] : memref<64x1000xbf16, #tpu.memory_space<vmem>>, vector<64x1000xbf16>
    %cst_33 = arith.constant dense<0.000000e+00> : vector<5x1000xf32>
    %43 = tpu.matmul %41, %42, %cst_33 {dimension_numbers = #tpu.dot_dimension_numbers<[1], [0], [0], [1], [0, 0, 1, 1], [], []>} : vector<5x64xbf16>, vector<64x1000xbf16>, vector<5x1000xf32> -> vector<5x1000xf32>
    %44 = arith.addf %40, %43 : vector<5x1000xf32>
    %c0_34 = arith.constant 0 : index
    %c0_35 = arith.constant 0 : index
    %c0_36 = arith.constant 0 : index
    %45 = vector.load %arg13[%c0_34, %c0_35, %c0_36] : memref<1x5x1000xf32, #tpu.memory_space<vmem>>, vector<1x5x1000xf32>
    %46 = vector.shape_cast %45 : vector<1x5x1000xf32> to vector<5x1000xf32>
    %47 = vector.shape_cast %44 : vector<5x1000xf32> to vector<1x5x1000xf32>
    tpu.vector_store %arg13[%c0_34, %c0_35, %c0_36], %47 {strides = array<i32>} : memref<1x5x1000xf32, #tpu.memory_space<vmem>>, vector<1x5x1000xf32>,
    return
  }
  func.func @transform_0(%arg0: i32) -> (i32, i32, i32) {
    %c0_i32 = arith.constant 0 : i32
    %c0_i32_0 = arith.constant 0 : i32
    %c0_i32_1 = arith.constant 0 : i32
    return %arg0, %c0_i32, %c0_i32_0 : i32, i32, i32
  }
  func.func @transform_1(%arg0: i32) -> (i32, i32, i32) {
    %c0_i32 = arith.constant 0 : i32
    %c0_i32_0 = arith.constant 0 : i32
    %c0_i32_1 = arith.constant 0 : i32
    return %arg0, %c0_i32, %c0_i32_0 : i32, i32, i32
  }
  func.func @transform_2(%arg0: i32) -> (i32, i32) {
    %c0_i32 = arith.constant 0 : i32
    %c0_i32_0 = arith.constant 0 : i32
    %c0_i32_1 = arith.constant 0 : i32
    return %c0_i32, %c0_i32_0 : i32, i32
  }
  func.func @transform_3(%arg0: i32) -> (i32, i32) {
    %c0_i32 = arith.constant 0 : i32
    %c0_i32_0 = arith.constant 0 : i32
    %c0_i32_1 = arith.constant 0 : i32
    return %c0_i32, %c0_i32_0 : i32, i32
  }
  func.func @transform_4(%arg0: i32) -> (i32, i32) {
    %c0_i32 = arith.constant 0 : i32
    %c0_i32_0 = arith.constant 0 : i32
    %c0_i32_1 = arith.constant 0 : i32
    return %c0_i32, %c0_i32_0 : i32, i32
  }
  func.func @transform_5(%arg0: i32) -> (i32, i32) {
    %c0_i32 = arith.constant 0 : i32
    %c0_i32_0 = arith.constant 0 : i32
    %c0_i32_1 = arith.constant 0 : i32
    return %c0_i32, %c0_i32_0 : i32, i32
  }
  func.func @transform_6(%arg0: i32) -> (i32, i32) {
    %c0_i32 = arith.constant 0 : i32
    %c0_i32_0 = arith.constant 0 : i32
    %c0_i32_1 = arith.constant 0 : i32
    return %c0_i32, %c0_i32_0 : i32, i32
  }
  func.func @transform_7(%arg0: i32) -> (i32, i32) {
    %c0_i32 = arith.constant 0 : i32
    %c0_i32_0 = arith.constant 0 : i32
    %c0_i32_1 = arith.constant 0 : i32
    return %c0_i32, %c0_i32_0 : i32, i32
  }
  func.func @transform_8(%arg0: i32) -> (i32, i32) {
    %c0_i32 = arith.constant 0 : i32
    %c0_i32_0 = arith.constant 0 : i32
    %c0_i32_1 = arith.constant 0 : i32
    return %c0_i32, %c0_i32_0 : i32, i32
  }
  func.func @transform_9(%arg0: i32) -> (i32, i32) {
    %c0_i32 = arith.constant 0 : i32
    %c0_i32_0 = arith.constant 0 : i32
    %c0_i32_1 = arith.constant 0 : i32
    return %c0_i32, %c0_i32_0 : i32, i32
  }
  func.func @transform_10(%arg0: i32) -> (i32, i32) {
    %c0_i32 = arith.constant 0 : i32
    %c0_i32_0 = arith.constant 0 : i32
    %c0_i32_1 = arith.constant 0 : i32
    return %c0_i32, %c0_i32_0 : i32, i32
  }
  func.func @transform_11(%arg0: i32) -> (i32, i32) {
    %c0_i32 = arith.constant 0 : i32
    %c0_i32_0 = arith.constant 0 : i32
    %c0_i32_1 = arith.constant 0 : i32
    return %c0_i32, %c0_i32_0 : i32, i32
  }
  func.func @transform_12(%arg0: i32) -> (i32, i32, i32) {
    %c0_i32 = arith.constant 0 : i32
    %c0_i32_0 = arith.constant 0 : i32
    %c0_i32_1 = arith.constant 0 : i32
    return %arg0, %c0_i32, %c0_i32_0 : i32, i32, i32
  }
}

</mosaic_0001>

<bundles_post_ra>
// kernel: tpu_custom_call.1
= control target key start
LH: loop header
LB: loop body
LE: loop exit
PB: predicated region body
PF: predicated region fallthrough
CT: control target
= control target key end

     0   :  { %s5047_s0 = inlined_call_operand.hbm [shape: bf16[2,32,64], index: 0, kind: input, shape index: {}]   ;;  %s5048_s1 = inlined_call_operand.hbm [shape: bf16[2,8,512], index: 1, kind: input, shape index: {}]   ;;  %s5049_s2 = inlined_call_operand.hbm [shape: bf16[16,32], index: 2, kind: input, shape index: {}]   ;;  %s5050_s3 = inlined_call_operand.hbm [shape: f32[16,1], index: 3, kind: input, shape index: {}]   ;;  %s5051_s4 = inlined_call_operand.hbm [shape: f32[16,1], index: 4, kind: input, shape index: {}]   ;;  %s5052_s5 = inlined_call_operand.hbm [shape: bf16[16,32], index: 5, kind: input, shape index: {}]   ;;  %s5053_s6 = inlined_call_operand.hbm [shape: bf16[5,8], index: 6, kind: input, shape index: {}]   ;;  %s5054_s7 = inlined_call_operand.hbm [shape: f32[5,1], index: 7, kind: input, shape index: {}]   ;;  %s5055_s8 = inlined_call_operand.hbm [shape: bf16[5,16], index: 8, kind: input, shape index: {}]   ;;  %s5056_s9 = inlined_call_operand.hbm [shape: f32[5,1], index: 9, kind: input, shape index: {}]   ;;  %s5057_s10 = inlined_call_operand.hbm [shape: bf16[512,1000], index: 10, kind: input, shape index: {}]   ;;  %s5058_s11 = inlined_call_operand.hbm [shape: bf16[64,1000], index: 11, kind: input, shape index: {}]   ;;  %s5059_s12 = inlined_call_operand.hbm [shape: f32[2,5,1000], index: 12, kind: output, shape index: {}]  }
   0x1   :  { %5074 = sst [smem:[#allocation33_spill]] %s5047_s0 }
   0x2   :  { %5075 = sst [smem:[#allocation34_spill]] %s5048_s1 }
   0x3   :  { %5076 = sst [smem:[#allocation35_spill]] %s5049_s2 }
   0x4   :  { %5077 = sst [smem:[#allocation36_spill]] %s5050_s3 }
   0x5   :  { %5078 = sst [smem:[#allocation37_spill]] %s5051_s4 }
   0x6   :  { %5079 = sst [smem:[#allocation38_spill]] %s5052_s5 }
   0x7   :  { %5080 = sst [smem:[#allocation39_spill]] %s5053_s6 }
   0x8   :  { %5081 = sst [smem:[#allocation40_spill]] %s5054_s7 }
   0x9   :  { %5082 = sst [smem:[#allocation41_spill]] %s5055_s8 }
   0xa   :  { %5083 = sst [smem:[#allocation42_spill]] %s5059_s12 }
   0xb   :  { %17 = vsyncpa [#allocation3], 0 }
   0xc   :  { %19 = vsyncpa [#allocation3 + $0x1], 0 }
   0xd   :  { %20 = vsyncpa [#allocation6], 0 }
   0xe   :  { %22 = vsyncpa [#allocation6 + $0x1], 0 }
   0xf   :  { %23 = vsyncpa [#allocation9], 0 }
  0x10   :  { %24 = vsyncpa [#allocation12], 0 }
  0x11   :  { %25 = vsyncpa [#allocation15], 0 }
  0x12   :  { %26 = vsyncpa [#allocation18], 0 }
  0x13   :  { %27 = vsyncpa [#allocation21], 0 }
  0x14   :  { %28 = vsyncpa [#allocation4], 0 }
  0x15   :  { %30 = vsyncpa [#allocation4 + $0x1], 0  ;;  %s4505_s21 = smov 0   ;;  %s4507_s22 = smov 0  }
  0x16   :  { %s4509_s23 = smov 0   ;;  %s4511_s24 = smov 0  }
  0x17 LB: > { %s4418_s25 = smov [#allocation7]   ;;  %s4526_s27 = sadd.s32 4294967295, %s4416_s24   ;;  %s4416_s24 = sphi %s4511_s24, %s5131_s24   ;;  %s4412_s23 = sphi %s4509_s23, %s5130_s23   ;;  %s4408_s22 = sphi %s4507_s22, %s5129_s22   ;;  %s4404_s21 = sphi %s4505_s21, %s5128_s21  }
  0x18   : > { %s341_s26 = sshll.u32 %s4418_s25, 4  ;;  %p3392_p0 = scmp.ge.s32.totalorder %s4416_s24, 1  ;;  %s4531_s26 = int_to_ptr.vmem [resolvable:$true] %s341_s26 }
  0x19   : > { %p5066_p1 = scmp.eq.s32.totalorder %s4526_s27, 0  ;;  %p329_p2 = scmp.lt.s32.totalorder %s4416_s24, 3 }
  0x1a   : > { %s4419_s29 = smov [#allocation8]   ;;  %s4420_s14 = smov [#allocation11]  }
  0x1b   : > { %p4533_p3 = pnand %p3392_p0, %p329_p2  ;;  %s354_s30 = sshll.u32 %s4419_s29, 4  ;;  %s4546_s30 = int_to_ptr.vmem [resolvable:$true] %s354_s30 }
  0x1c   : > { %s4548_s15 = sshll.u32 %s4420_s14, 4  ;;  %s5087_s2 = sld [smem:[#allocation35_spill]]  ;;  %s381_s15 = int_to_ptr.vmem [resolvable:$true] %s4548_s15 }
  0x1d   : > { %s5084_s28 = scalar_select %p4533_p3, 1, 0 }
  0x1e   : > { %p3849_p5 = pneg %p4533_p3 }
  0x1f   : > { %5085 = sst [smem:[#allocation32_spill]] %s5084_s28 }
  0x20   : > { %p4542_p6 = pnand %p3849_p5, %p5066_p1 }
  0x22   : > { %s3982_s18 = scalar_lea.hbm %s5087_s2, 128  ;;  %p4558_p8 = pneg %p4542_p6 }
  0x23   : > { %p3983_p7 = scmp.ne.s32.totalorder %s5087_s2, %s3982_s18  ;;  %p3989_p11 = scmp.lt.u32.totalorder %s3982_s18, %s5087_s2 }
  0x25   : > { %p3985_p9 = pnand %p4558_p8, %p3983_p7 }
  0x27   : > { %p3986_p10 = pneg %p3985_p9 }
  0x29   : > { %p3991_p12 = pnand %p3989_p11, %p3986_p10 }
  0x2b   : > { %3994 = shalt.err (!%p3991_p12)
}
  0x2c   : > { %s3995_s16 = scalar_lea.vmem %s4531_s26, 128  ;;  %p4003_p5 = scmp.lt.s32.totalorder %s4531_s26, %s4531_s26 }
  0x2d   : > { %p3996_p13 = scmp.ne.s32.totalorder %s4531_s26, %s3995_s16  ;;  %p4004_p4 = scmp.lt.s32.totalorder %s3995_s16, %s3995_s16 }
  0x2f   : > { %p3998_p0 = pnand %p3996_p13, %p4558_p8  ;;  %p4005_p7 = por %p4004_p4, %p4003_p5 }
  0x31   : > { %p3999_p2 = pneg %p3998_p0 }
  0x33   : > { %p4006_p9 = pnand %p4005_p7, %p3999_p2 }
  0x35   : > { %4009 = shalt.err (!%p4006_p9)
}
  0x36   : > { %s5064_s17 = smov 64   ;;  %s5070_s18 = smov 4  }
  0x37   : > { %3852 = dma.hbm_to_vmem [thread:$0]  (!%p4542_p6), %s5087_s2, 128, %s4531_s26, [#allocation6], %s5064_s17, %s5064_s17, %s5070_s18  }
  0x38   : > { %s5089_s3 = sld [smem:[#allocation36_spill]] }
  0x3e   : > { %s4010_s16 = scalar_lea.hbm %s5089_s3, 256 }
  0x3f   : > { %p4011_p4 = scmp.ne.s32.totalorder %s5089_s3, %s4010_s16  ;;  %p4017_p12 = scmp.lt.u32.totalorder %s4010_s16, %s5089_s3 }
  0x41   : > { %p4013_p10 = pnand %p4011_p4, %p4558_p8 }
  0x43   : > { %p4014_p11 = pneg %p4013_p10 }
  0x45   : > { %p4019_p13 = pnand %p4017_p12, %p4014_p11 }
  0x47   : > { %4022 = shalt.err (!%p4019_p13)
}
  0x48   : > { %s4023_s26 = scalar_lea.vmem %s4546_s30, 256  ;;  %p4031_p7 = scmp.lt.s32.totalorder %s4546_s30, %s4546_s30 }
  0x49   : > { %p4024_p0 = scmp.ne.s32.totalorder %s4546_s30, %s4023_s26  ;;  %p4032_p9 = scmp.lt.s32.totalorder %s4023_s26, %s4023_s26 }
  0x4b   : > { %p4026_p2 = pnand %p4024_p0, %p4558_p8  ;;  %p4033_p4 = por %p4032_p9, %p4031_p7 }
  0x4d   : > { %p4027_p5 = pneg %p4026_p2 }
  0x4f   : > { %p4034_p10 = pnand %p4033_p4, %p4027_p5 }
  0x51   : > { %4037 = shalt.err (!%p4034_p10)
}
  0x52   : > { %s5068_s12 = smov 128   ;;  %s5069_s0 = smov 8  }
  0x53   : > { %3855 = dma.hbm_to_vmem [thread:$0]  (!%p4542_p6), %s5089_s3, 256, %s4546_s30, [#allocation9], %s5068_s12, %s5068_s12, %s5069_s0  }
  0x54   : > { %s5090_s5 = sld [smem:[#allocation38_spill]] }
  0x5a   : > { %s4038_s29 = scalar_lea.hbm %s5090_s5, 128 }
  0x5b   : > { %p4039_p11 = scmp.ne.s32.totalorder %s5090_s5, %s4038_s29  ;;  %p4045_p0 = scmp.lt.u32.totalorder %s4038_s29, %s5090_s5 }
  0x5d   : > { %p4041_p12 = pnand %p4039_p11, %p4558_p8 }
  0x5f   : > { %p4042_p13 = pneg %p4041_p12 }
  0x61   : > { %p4047_p2 = pnand %p4045_p0, %p4042_p13 }
  0x63   : > { %4050 = shalt.err (!%p4047_p2)
}
  0x64   : > { %s4051_s1 = scalar_lea.vmem %s381_s15, 128  ;;  %p4059_p4 = scmp.lt.s32.totalorder %s381_s15, %s381_s15 }
  0x65   : > { %p4052_p5 = scmp.ne.s32.totalorder %s381_s15, %s4051_s1  ;;  %p4060_p10 = scmp.lt.s32.totalorder %s4051_s1, %s4051_s1 }
  0x67   : > { %p4054_p7 = pnand %p4052_p5, %p4558_p8  ;;  %p4061_p1 = por %p4060_p10, %p4059_p4 }
  0x69   : > { %p4055_p9 = pneg %p4054_p7 }
  0x6b   : > { %p4062_p3 = pnand %p4061_p1, %p4055_p9 }
  0x6d   : > { %4065 = shalt.err (!%p4062_p3)
}
  0x6e   : > { %s5091_s30 = smov 64   ;;  %s4425_s19 = smov [#allocation14]  }
  0x6f   : > { %3861 = dma.hbm_to_vmem [thread:$0]  (!%p4542_p6), %s5090_s5, 128, %s381_s15, [#allocation12], %s5091_s30, %s5091_s30, %s5070_s18  }
  0x70   : > { %s405_s20 = sshll.u32 %s4425_s19, 4  ;;  %s4426_s29 = smov [#allocation17]   ;;  %s406_s20 = int_to_ptr.vmem [resolvable:$true] %s405_s20 }
  0x71   : > { %s427_s14 = sshll.u32 %s4426_s29, 4  ;;  %s5092_s7 = sld [smem:[#allocation40_spill]]  ;;  %s428_s14 = int_to_ptr.vmem [resolvable:$true] %s427_s14 }
  0x77   : > { %s4066_s1 = scalar_lea.hbm %s5092_s7, 128 }
  0x78   : > { %p4067_p1 = scmp.ne.s32.totalorder %s5092_s7, %s4066_s1  ;;  %p4073_p12 = scmp.lt.u32.totalorder %s4066_s1, %s5092_s7 }
  0x7a   : > { %p4069_p3 = pnand %p4067_p1, %p4558_p8 }
  0x7c   : > { %p4070_p11 = pneg %p4069_p3 }
  0x7e   : > { %p4075_p13 = pnand %p4073_p12, %p4070_p11 }
  0x80   : > { %4078 = shalt.err (!%p4075_p13)
}
  0x81   : > { %s4079_s15 = scalar_lea.vmem %s406_s20, 128  ;;  %p4087_p7 = scmp.lt.s32.totalorder %s406_s20, %s406_s20 }
  0x82   : > { %p4080_p0 = scmp.ne.s32.totalorder %s406_s20, %s4079_s15  ;;  %p4088_p9 = scmp.lt.s32.totalorder %s4079_s15, %s4079_s15 }
  0x84   : > { %p4082_p2 = pnand %p4080_p0, %p4558_p8  ;;  %p4089_p4 = por %p4088_p9, %p4087_p7 }
  0x86   : > { %p4083_p5 = pneg %p4082_p2 }
  0x88   : > { %p4090_p10 = pnand %p4089_p4, %p4083_p5 }
  0x8a   : > { %4093 = shalt.err (!%p4090_p10)
}
  0x8b   : > { %3867 = dma.hbm_to_vmem [thread:$0]  (!%p4542_p6), %s5092_s7, 128, %s406_s20, [#allocation15]  }
  0x8c   : > { %s4094_s19 = scalar_lea.hbm %s5056_s9, 128 }
  0x8d   : > { %p4095_p1 = scmp.ne.s32.totalorder %s5056_s9, %s4094_s19  ;;  %p4101_p12 = scmp.lt.u32.totalorder %s4094_s19, %s5056_s9 }
  0x8f   : > { %p4097_p3 = pnand %p4095_p1, %p4558_p8 }
  0x91   : > { %p4098_p11 = pneg %p4097_p3 }
  0x93   : > { %p4103_p13 = pnand %p4101_p12, %p4098_p11 }
  0x95   : > { %4106 = shalt.err (!%p4103_p13)
}
  0x96   : > { %s4107_s17 = scalar_lea.vmem %s428_s14, 128  ;;  %p4115_p7 = scmp.lt.s32.totalorder %s428_s14, %s428_s14 }
  0x97   : > { %p4108_p0 = scmp.ne.s32.totalorder %s428_s14, %s4107_s17  ;;  %p4116_p9 = scmp.lt.s32.totalorder %s4107_s17, %s4107_s17 }
  0x99   : > { %p4110_p2 = pnand %p4108_p0, %p4558_p8  ;;  %p4117_p4 = por %p4116_p9, %p4115_p7 }
  0x9b   : > { %p4111_p5 = pneg %p4110_p2 }
  0x9d   : > { %p4118_p10 = pnand %p4117_p4, %p4111_p5 }
  0x9f   : > { %4121 = shalt.err (!%p4118_p10)
}
  0xa0   : > { %3873 = dma.hbm_to_vmem [thread:$0]  (!%p4542_p6), %s5056_s9, 128, %s428_s14, [#allocation18]  }
  0xa1   : > { %s4427_s12 = smov [#allocation10]   ;;  %s4428_s2 = smov [#allocation13]  }
  0xa2   : > { %s367_s0 = sshll.u32 %s4427_s12, 4  ;;  %s394_s28 = sshll.u32 %s4428_s2, 4  ;;  %s368_s0 = int_to_ptr.vmem [resolvable:$true] %s367_s0  ;;  %s395_s28 = int_to_ptr.vmem [resolvable:$true] %s394_s28 }
  0xa3   : > { %s5093_s4 = sld [smem:[#allocation37_spill]] }
  0xa9   : > { %s4122_s16 = scalar_lea.hbm %s5093_s4, 256 }
  0xaa   : > { %p4123_p1 = scmp.ne.s32.totalorder %s5093_s4, %s4122_s16  ;;  %p4129_p12 = scmp.lt.u32.totalorder %s4122_s16, %s5093_s4 }
  0xac   : > { %p4125_p3 = pnand %p4123_p1, %p4558_p8 }
  0xae   : > { %p4126_p11 = pneg %p4125_p3 }
  0xb0   : > { %p4131_p13 = pnand %p4129_p12, %p4126_p11 }
  0xb2   : > { %4134 = shalt.err (!%p4131_p13)
}
  0xb3   : > { %s4135_s14 = scalar_lea.vmem %s368_s0, 256  ;;  %p4143_p7 = scmp.lt.s32.totalorder %s368_s0, %s368_s0 }
  0xb4   : > { %p4136_p0 = scmp.ne.s32.totalorder %s368_s0, %s4135_s14  ;;  %p4144_p9 = scmp.lt.s32.totalorder %s4135_s14, %s4135_s14 }
  0xb6   : > { %p4138_p2 = pnand %p4136_p0, %p4558_p8  ;;  %p4145_p4 = por %p4144_p9, %p4143_p7 }
  0xb8   : > { %p4139_p5 = pneg %p4138_p2 }
  0xba   : > { %p4146_p10 = pnand %p4145_p4, %p4139_p5 }
  0xbc   : > { %4149 = shalt.err (!%p4146_p10)
}
  0xbd   : > { %s5094_s15 = smov 8   ;;  %s5095_s12 = smov 128  }
  0xbe   : > { %3858 = dma.hbm_to_vmem [thread:$0]  (!%p4542_p6), %s5093_s4, 256, %s368_s0, [#allocation9], %s5095_s12, %s5095_s12, %s5094_s15  }
  0xbf   : > { %s5096_s6 = sld [smem:[#allocation39_spill]] }
  0xc5   : > { %s4150_s26 = scalar_lea.hbm %s5096_s6, 64 }
  0xc6   : > { %p4151_p1 = scmp.ne.s32.totalorder %s5096_s6, %s4150_s26  ;;  %p4157_p12 = scmp.lt.u32.totalorder %s4150_s26, %s5096_s6 }
  0xc8   : > { %p4153_p3 = pnand %p4151_p1, %p4558_p8 }
  0xca   : > { %p4154_p11 = pneg %p4153_p3 }
  0xcc   : > { %p4159_p13 = pnand %p4157_p12, %p4154_p11 }
  0xce   : > { %4162 = shalt.err (!%p4159_p13)
}
  0xcf   : > { %s4163_s2 = scalar_lea.vmem %s395_s28, 64  ;;  %p4171_p7 = scmp.lt.s32.totalorder %s395_s28, %s395_s28 }
  0xd0   : > { %p4164_p0 = scmp.ne.s32.totalorder %s395_s28, %s4163_s2  ;;  %p4172_p9 = scmp.lt.s32.totalorder %s4163_s2, %s4163_s2 }
  0xd2   : > { %p4166_p2 = pnand %p4164_p0, %p4558_p8  ;;  %p4173_p4 = por %p4172_p9, %p4171_p7 }
  0xd4   : > { %p4167_p5 = pneg %p4166_p2 }
  0xd6   : > { %p4174_p10 = pnand %p4173_p4, %p4167_p5 }
  0xd8   : > { %4177 = shalt.err (!%p4174_p10)
}
  0xd9   : > { %3864 = dma.hbm_to_vmem [thread:$0]  (!%p4542_p6), %s5096_s6, 64, %s395_s28, [#allocation12]  }
  0xda   : > { %s4429_s12 = smov [#allocation16]   ;;  %s4430_s29 = smov [#allocation19]  }
  0xdb   : > { %s416_s19 = sshll.u32 %s4429_s12, 4  ;;  %s437_s16 = sshll.u32 %s4430_s29, 4  ;;  %s417_s19 = int_to_ptr.vmem [resolvable:$true] %s416_s19  ;;  %s438_s16 = int_to_ptr.vmem [resolvable:$true] %s437_s16 }
  0xdc   : > { %s5097_s8 = sld [smem:[#allocation41_spill]] }
  0xe2   : > { %s4178_s17 = scalar_lea.hbm %s5097_s8, 64 }
  0xe3   : > { %p4179_p1 = scmp.ne.s32.totalorder %s5097_s8, %s4178_s17  ;;  %p4185_p12 = scmp.lt.u32.totalorder %s4178_s17, %s5097_s8 }
  0xe5   : > { %p4181_p3 = pnand %p4179_p1, %p4558_p8 }
  0xe7   : > { %p4182_p11 = pneg %p4181_p3 }
  0xe9   : > { %p4187_p13 = pnand %p4185_p12, %p4182_p11 }
  0xeb   : > { %4190 = shalt.err (!%p4187_p13)
}
  0xec   : > { %s4191_s28 = scalar_lea.vmem %s417_s19, 64  ;;  %p4199_p7 = scmp.lt.s32.totalorder %s417_s19, %s417_s19 }
  0xed   : > { %p4192_p0 = scmp.ne.s32.totalorder %s417_s19, %s4191_s28  ;;  %p4200_p9 = scmp.lt.s32.totalorder %s4191_s28, %s4191_s28 }
  0xef   : > { %p4194_p2 = pnand %p4192_p0, %p4558_p8  ;;  %p4201_p4 = por %p4200_p9, %p4199_p7 }
  0xf1   : > { %p4195_p5 = pneg %p4194_p2 }
  0xf3   : > { %p4202_p10 = pnand %p4201_p4, %p4195_p5 }
  0xf5   : > { %4205 = shalt.err (!%p4202_p10)
}
  0xf6   : > { %3870 = dma.hbm_to_vmem [thread:$0]  (!%p4542_p6), %s5097_s8, 64, %s417_s19, [#allocation15]  }
  0xf7   : > { %s4206_s1 = scalar_lea.hbm %s5057_s10, 32768 }
  0xf8   : > { %p4207_p1 = scmp.ne.s32.totalorder %s5057_s10, %s4206_s1  ;;  %p4213_p12 = scmp.lt.u32.totalorder %s4206_s1, %s5057_s10 }
  0xfa   : > { %p4209_p3 = pnand %p4207_p1, %p4558_p8 }
  0xfc   : > { %p4210_p11 = pneg %p4209_p3 }
  0xfe   : > { %p4215_p13 = pnand %p4213_p12, %p4210_p11 }
 0x100   : > { %4218 = shalt.err (!%p4215_p13)
}
 0x101   : > { %s4219_s0 = scalar_lea.vmem %s438_s16, 32768  ;;  %p4227_p7 = scmp.lt.s32.totalorder %s438_s16, %s438_s16 }
 0x102   : > { %p4220_p0 = scmp.ne.s32.totalorder %s438_s16, %s4219_s0  ;;  %p4228_p9 = scmp.lt.s32.totalorder %s4219_s0, %s4219_s0 }
 0x104   : > { %p4222_p2 = pnand %p4220_p0, %p4558_p8  ;;  %p4229_p4 = por %p4228_p9, %p4227_p7 }
 0x106   : > { %p4223_p5 = pneg %p4222_p2 }
 0x108   : > { %p4230_p10 = pnand %p4229_p4, %p4223_p5 }
 0x10a   : > { %4233 = shalt.err (!%p4230_p10)
}
 0x10b   : > { %s4431_s19 = smov 512   ;;  %s4432_s28 = smov 32  }
 0x10c   : > { %3876 = dma.hbm_to_vmem [thread:$0]  (!%p4542_p6), %s5057_s10, 32768, %s438_s16, [#allocation18], %s4431_s19, %s4431_s19, %s4432_s28  }
 0x10d   : > { %s4433_s29 = smov [#allocation20]   ;;  %s4234_s20 = scalar_lea.hbm %s5058_s11, 4096 }
 0x10e   : > { %s450_s26 = sshll.u32 %s4433_s29, 4  ;;  %p4235_p1 = scmp.ne.s32.totalorder %s5058_s11, %s4234_s20  ;;  %s451_s26 = int_to_ptr.vmem [resolvable:$true] %s450_s26 }
 0x10f   : > { %p4241_p12 = scmp.lt.u32.totalorder %s4234_s20, %s5058_s11 }
 0x110   : > { %p4237_p3 = pnand %p4235_p1, %p4558_p8 }
 0x112   : > { %p4238_p11 = pneg %p4237_p3 }
 0x114   : > { %p4243_p13 = pnand %p4241_p12, %p4238_p11 }
 0x116   : > { %4246 = shalt.err (!%p4243_p13)
}
 0x117   : > { %s4247_s16 = scalar_lea.vmem %s451_s26, 4096  ;;  %p4255_p7 = scmp.lt.s32.totalorder %s451_s26, %s451_s26 }
 0x118   : > { %p4248_p0 = scmp.ne.s32.totalorder %s451_s26, %s4247_s16  ;;  %p4256_p9 = scmp.lt.s32.totalorder %s4247_s16, %s4247_s16 }
 0x11a   : > { %p4250_p2 = pnand %p4248_p0, %p4558_p8  ;;  %p4257_p4 = por %p4256_p9, %p4255_p7 }
 0x11c   : > { %p4251_p5 = pneg %p4250_p2 }
 0x11e   : > { %p4258_p10 = pnand %p4257_p4, %p4251_p5 }
 0x120   : > { %4261 = shalt.err (!%p4258_p10)
}
 0x121   : > { %3879 = dma.hbm_to_vmem [thread:$0]  (!%p4542_p6), %s5058_s11, 4096, %s451_s26, [#allocation21], %s4431_s19, %s4431_s19, %s4432_s28  }
 0x122   : > { %s3391_s25 = sadd.s32 4294967294, %s4416_s24   ;;  %s4761_s13 = sadd.s32 1, %s4416_s24  }
 0x123   : > { %s40_s18 = ssub.s32 %s4416_s24, %s4761_s13  ;;  %s43_s29 = sadd.s32 1, %s4412_s23 }
 0x124   : > { %p41_p8 = scmp.eq.s32.totalorder %s40_s18, 0  ;;  %p50_p1 = scmp.ne.s32.totalorder %s4412_s23, %s4408_s22 }
 0x125   : > { %p51_p3 = scmp.eq.s32.totalorder %s4416_s24, 0  ;;  %p56_p11 = scmp.ne.s32.totalorder %s4408_s22, %s4404_s21 }
 0x126   : > { %s4772_s1 = scalar_select %p41_p8, %s4412_s23, %s43_s29  }
 0x127   : > { %p4774_p12 = por %p51_p3, %p50_p1  ;;  %p5099_p6 = scmp.eq.s32.totalorder %s4526_s27, 0 }
 0x128   : > { %p316_p0 = scmp.eq.s32.totalorder %s4526_s27, 1  ;;  %p322_p2 = scmp.eq.s32.totalorder %s3391_s25, 1 }
 0x129   : > { %p4780_p13 = por %p5099_p6, %p56_p11  ;;  %p3901_p5 = scmp.lt.s32.totalorder %s4416_s24, 2 }
 0x12a   : > { %s464_s28 = sand.u32 1, %s4412_s23   ;;  %p4787_p7 = por %p316_p0, %p50_p1 }
 0x12b   : > { %s5100_s19 = scalar_select %p4780_p13, 1, 0 }
 0x12c   : > { %s5101_s26 = scalar_select %p4787_p7, 1, 0 }
 0x12d   : > { %p4791_p9 = por %p322_p2, %p56_p11  ;;  %s4795_s14 = sshll.u32 %s464_s28, 4 }
 0x12e   : > { %s5071_s2 = sshll.u32 %s4416_s24, 8  ;;  %s5103_s15 = sld [smem:[#allocation33_spill]] }
 0x12f   : > { %s5102_s20 = scalar_select %p4791_p9, 1, 0 }
 0x130   : > { %s468_s25 = scalar_lea.vmem [#allocation2], %s4795_s14  ;;  %p4810_p4 = pnand %p3901_p5, %p4774_p12 }
 0x131   : > { %s475_s18 = sshll.u32 %s468_s25, 4  ;;  %s4815_s4 = scalar_lea.sflag [#allocation3], %s464_s28  ;;  %s4806_s18 = int_to_ptr.vmem [resolvable:$true] %s475_s18 }
 0x132   : > { %p4264_p8 = pneg %p4810_p4 }
 0x134   : > { %s4803_s12 = scalar_lea.hbm %s5103_s15, %s5071_s2  ;;  %s4267_s17 = scalar_lea.hbm %s5103_s15, 512 }
 0x135   : > { %s4262_s0 = scalar_lea.hbm %s4803_s12, 256  ;;  %p4268_p11 = scmp.lt.u32.totalorder %s4803_s12, %s5103_s15 }
 0x136   : > { %p4263_p10 = scmp.ne.s32.totalorder %s4803_s12, %s4262_s0  ;;  %p4269_p12 = scmp.lt.u32.totalorder %s4267_s17, %s4262_s0 }
 0x137   : > { %p4271_p0 = scmp.lt.u32.totalorder %s4262_s0, %s4803_s12 }
 0x138   : > { %p4265_p1 = pnand %p4264_p8, %p4263_p10  ;;  %p4270_p6 = por %p4269_p12, %p4268_p11 }
 0x13a   : > { %p4266_p3 = pneg %p4265_p1  ;;  %p4272_p2 = por %p4271_p0, %p4270_p6 }
 0x13c   : > { %p4273_p5 = pnand %p4272_p2, %p4266_p3 }
 0x13e   : > { %4276 = shalt.err (!%p4273_p5)
}
 0x13f   : > { %s4277_s28 = scalar_lea.vmem %s4806_s18, 256  ;;  %s4434_s16 = smov [#allocation2]  }
 0x140   : > { %p4278_p10 = scmp.ne.s32.totalorder %s4806_s18, %s4277_s28  ;;  %s4282_s25 = sshll.u32 %s4434_s16, 4  ;;  %s4283_s25 = int_to_ptr.vmem [resolvable:$false] %s4282_s25 }
 0x141   : > { %s4284_s5 = scalar_lea.vmem %s4283_s25, 512  ;;  %p4285_p7 = scmp.lt.s32.totalorder %s4806_s18, %s4283_s25 }
 0x142   : > { %p4280_p1 = pnand %p4278_p10, %p4264_p8  ;;  %p4286_p11 = scmp.lt.s32.totalorder %s4284_s5, %s4277_s28 }
 0x144   : > { %p4281_p9 = pneg %p4280_p1  ;;  %p4287_p12 = por %p4286_p11, %p4285_p7 }
 0x146   : > { %p4288_p6 = pnand %p4287_p12, %p4281_p9 }
 0x148   : > { %4291 = shalt.err (!%p4288_p6)
}
 0x149   : > { %s5105_s2 = smov 4   ;;  %s5106_s0 = sshll.u32 %s4416_s24, 8 }
 0x14a   : > { %3883 = dma.hbm_to_vmem [thread:$0]  (!%p4810_p4), %s4803_s12, 256, %s4806_s18, %s4815_s4, %s5091_s30, %s5091_s30, %s5105_s2  }
 0x14b   : > { %s5107_s28 = sld [smem:[#allocation34_spill]]  ;;  %s489_s5 = scalar_lea.vmem [#allocation5], %s4795_s14 }
 0x14c   : > { %s497_s3 = sshll.u32 %s489_s5, 4  ;;  %s5108_s6 = sand.u32 1, %s4416_s24   ;;  %s498_s3 = int_to_ptr.vmem [resolvable:$true] %s497_s3 }
 0x14d   : > { %s486_s7 = scalar_lea.sflag [#allocation6], %s5108_s6 }
 0x151   : > { %s4851_s25 = scalar_lea.hbm %s5107_s28, %s5106_s0  ;;  %s4297_s12 = scalar_lea.hbm %s5107_s28, 512 }
 0x152   : > { %s4292_s8 = scalar_lea.hbm %s4851_s25, 256  ;;  %p4298_p0 = scmp.lt.u32.totalorder %s4851_s25, %s5107_s28 }
 0x153   : > { %p4293_p7 = scmp.ne.s32.totalorder %s4851_s25, %s4292_s8  ;;  %p4299_p2 = scmp.lt.u32.totalorder %s4297_s12, %s4292_s8 }
 0x154   : > { %p4301_p10 = scmp.lt.u32.totalorder %s4292_s8, %s4851_s25 }
 0x155   : > { %p4295_p9 = pnand %p4293_p7, %p4264_p8  ;;  %p4300_p5 = por %p4299_p2, %p4298_p0 }
 0x157   : > { %p4296_p3 = pneg %p4295_p9  ;;  %p4302_p1 = por %p4301_p10, %p4300_p5 }
 0x159   : > { %p4303_p11 = pnand %p4302_p1, %p4296_p3 }
 0x15b   : > { %4306 = shalt.err (!%p4303_p11)
}
 0x15c   : > { %s4307_s6 = scalar_lea.vmem %s498_s3, 256  ;;  %s4435_s14 = smov [#allocation5]  }
 0x15d   : > { %p4308_p12 = scmp.ne.s32.totalorder %s498_s3, %s4307_s6  ;;  %s4312_s0 = sshll.u32 %s4435_s14, 4  ;;  %s4313_s0 = int_to_ptr.vmem [resolvable:$false] %s4312_s0 }
 0x15e   : > { %s4314_s17 = scalar_lea.vmem %s4313_s0, 512  ;;  %p4315_p9 = scmp.lt.s32.totalorder %s498_s3, %s4313_s0 }
 0x15f   : > { %p4310_p6 = pnand %p4308_p12, %p4264_p8  ;;  %p4316_p13 = scmp.lt.s32.totalorder %s4314_s17, %s4307_s6 }
 0x161   : > { %p4311_p7 = pneg %p4310_p6  ;;  %p4317_p0 = por %p4316_p13, %p4315_p9 }
 0x163   : > { %p4318_p2 = pnand %p4317_p0, %p4311_p7 }
 0x165   : > { %4321 = shalt.err (!%p4318_p2)
}
 0x166   : > { %3886 = dma.hbm_to_vmem [thread:$0]  (!%p4810_p4), %s4851_s25, 256, %s498_s3, %s486_s7  }
 0x167   : > { %s5109_s8 = sld [smem:[#allocation32_spill]] }
 0x16d   : > { %p5110_p3 = scmp.ne.s32.totalorder %s5109_s8, 0 }
 0x16e   : > { %s4878_s16 = sand.u32 (!%p5110_p3), 1, %s4408_s22   ;;  %p5111_p13 = scmp.ne.s32.totalorder (!%p5110_p3), %s5100_s19, 0 }
 0x16f   : > { %506 = sbr.rel (%p5110_p3) target bundleno = 1518 (0x5ee), region = 68  ;;  %s3411_s5 = sshll.u32 (!%p5110_p3), %s4878_s16, 4 }
 0x170   : > { %s509_s4 = scalar_lea.sflag (!%p5110_p3), [#allocation3], %s4878_s16  ;;  %s4882_s30 = scalar_lea.vmem (!%p5110_p3), [#allocation2], %s3411_s5 }
 0x176   : > { %4367 = dma.done.wait (%p5111_p13), %s509_s4, 256  }
 0x177   : > { %4369 = vsyncadd (%p5111_p13), %s509_s4, 4294967040  ;;  %s517_s3 = sand.u32 1, %s4526_s27   ;;  %s4889_s29 = scalar_lea.vmem [#allocation5], %s3411_s5 }
 0x178   : > { %s518_s7 = scalar_lea.sflag [#allocation6], %s517_s3 }
 0x179   : > { %4371 = dma.done.wait (%p5111_p13), %s518_s7, 256  }
 0x17a   : > { %4373 = vsyncadd (%p5111_p13), %s518_s7, 4294967040  ;;  %p5112_p4 = scmp.eq.s32.totalorder %s4526_s27, 0 }
 0x17c   : > { %4375 = dma.done.wait (%p5112_p4), [#allocation6], 128   ;;  %p5113_p8 = pmov %p5112_p4 }
 0x17d   : > { %p5114_p5 = pmov %p5112_p4 }
 0x17e   : > { %4377 = vsyncadd (%p5113_p8), [#allocation6], 4294967168 }
 0x17f   : > { %4379 = dma.done.wait (%p5114_p5), [#allocation9], 512   ;;  %p5115_p10 = pmov %p5112_p4 }
 0x180   : > { %p5116_p1 = pmov %p5112_p4 }
 0x181   : > { %4381 = vsyncadd (%p5115_p10), [#allocation9], 4294966784 }
 0x182   : > { %4383 = dma.done.wait (%p5116_p1), [#allocation12], 192   ;;  %p5117_p11 = pmov %p5116_p1 }
 0x183   : > { %p5118_p12 = pmov %p5116_p1 }
 0x184   : > { %4385 = vsyncadd (%p5117_p11), [#allocation12], 4294967104 }
 0x185   : > { %4387 = dma.done.wait (%p5118_p12), [#allocation15], 192   ;;  %p5119_p6 = pmov %p5116_p1 }
 0x186   : > { %p5120_p7 = pmov %p5116_p1 }
 0x187   : > { %4389 = vsyncadd (%p5119_p6), [#allocation15], 4294967104 }
 0x188   : > { %4391 = dma.done.wait (%p5120_p7), [#allocation18], 32896   ;;  %p5121_p9 = pmov %p5116_p1 }
 0x189   : > { %p5122_p0 = pmov %p5116_p1 }
 0x18a   : > { %4393 = vsyncadd (%p5121_p9), [#allocation18], 4294934400 }
 0x18b   : > { %4395 = dma.done.wait (%p5122_p0), [#allocation21], 4096   ;;  %p5123_p2 = pmov %p5122_p0 }
 0x18c   : > { %v4436_v0 = vmov 0.0   ;;  %vm4437_vm0 = vmmov 0   ;;  %v4438_v1 = vmov 0   ;;  %v3966_v2 = vld [vmem:[%s4882_s30] sm:$0xff]   ;;  %v3967_v3 = vld [vmem:[%s4882_s30 + $0x8] sm:$0xff]   ;;  %vm856_vm1 = vcmask 1043456  }
 0x18d   : > { %4397 = vsyncadd (%p5123_p2), [#allocation21], 4294963200  ;;  %3757 = vmatprep.subr.bf16.mxu1 %v4436_v0  ;;  %3761 = vmatprep.mubr.msk.bf16.mxu1 %vm4437_vm0, %v4436_v0  ;;  %v612_v4 = vld [vmem:[%s4889_s29] sm:$0xff]  ;;  %v3968_v7 = vld [vmem:[#allocation11] sm:$0xff]   ;;  %vm633_vm2 = vcmask 261120   ;;  %vm852_vm3 = vcmask 64512  }
 0x18e   : > { %3749 = vmatprep.subr.bf16.mxu0 %v4436_v0  ;;  %3753 = vmatprep.mubr.msk.bf16.mxu0 %vm4437_vm0, %v4436_v0  ;;  %v3434_v5 = vcombine.high %v612_v4, %v612_v4  ;;  %v3433_v6 = vcombine.low %v612_v4, %v612_v4  ;;  %v3970_v8 = vld [vmem:[#allocation7] sm:$0xff]   ;;  %v4930_v10 = vld [vmem:[#allocation13] sm:$0x7]  ;;  %v678_v11 = vld [vmem:[#allocation8] sm:$0xff]  ;;  %vm759_vm4 = vcmask 523264   ;;  %vm791_vm5 = vcmask 130048  }
 0x18f   : > { %3964 = vset.pattern.permute.xlu1 %v4438_v1  ;;  %3965 = vset.pattern.permute.xlu0 %v4438_v1  ;;  %v679_v12 = vld [vmem:[#allocation8 + $0x8] sm:$0xff]  ;;  %v693_v13 = vld [vmem:[#allocation10 + $0x8] sm:$0xff]  ;;  %v692_v22 = vld [vmem:[#allocation10] sm:$0xff]  ;;  %s3423_s19 = sshll.u32 %s4878_s16, 6  ;;  %s3740_s12 = sshll.u32 %s4526_s27, 10  ;;  %vm3186_vm6 = vcmask 847872  }
 0x190   : > { %3758 = vmatpush3.bf16.msra.mxu1 %v3966_v2  ;;  %3750 = vmatpush3.bf16.msra.mxu0 %v3966_v2  ;;  %v858_v9 = vsel %vm856_vm1, %v3433_v6, 0  ;;  %v785_v14 = vld [vmem:[#allocation17] sm:$0x1f]  ;;  %v836_v15 = vld [vmem:[#allocation14] sm:$0x1f]  ;;  %v1212_v31 = vld [vmem:[#allocation20] sm:$0xff] }
 0x191   : > { %3759 = vmatprep.subr.bf16.mxu1 %v4436_v0  ;;  %3751 = vmatprep.subr.bf16.mxu0 %v4436_v0  ;;  %v1216_v32 = vld [vmem:[#allocation20 + $0x20] sm:$0xff]  ;;  %s606_s25 = scalar_lea.vmem [#allocation22], %s3423_s19  ;;  %s5124_s14 = sld [smem:[#allocation42_spill]] }
 0x192   : > { %682 = vperm.xlu1 %3964, %v678_v11   ;;  %v3441_v33 = vcombine.low %v1212_v31, %v1216_v32  ;;  %v3442_v34 = vcombine.high %v1212_v31, %v1216_v32  ;;  %v1220_v35 = vld [vmem:[#allocation20 + $0x40] sm:$0xff]  ;;  %v783_v11 = vld [vmem:[#allocation16] sm:$0x7]  ;;  %s3203_s18 = sshll.u32 %s606_s25, 4  ;;  %s3189_s27 = scalar_lea.sflag [#allocation4], %s4878_s16  ;;  %s5005_s18 = int_to_ptr.vmem [resolvable:$true] %s3203_s18 }
 0x193   : > { %v1224_v36 = vld [vmem:[#allocation20 + $0x60] sm:$0xff]  ;;  %s4322_s17 = scalar_lea.vmem %s5005_s18, 1024  ;;  %p5125_p13 = scmp.ne.s32.totalorder %s5101_s26, 0 }
 0x194   : > { %3760 = vmatpush3.bf16.msra.mxu1 %v3967_v3  ;;  %3752 = vmatpush3.bf16.msra.mxu0 %v3967_v3  ;;  %v3450_v37 = vcombine.high %v1220_v35, %v1224_v36  ;;  %v3449_v38 = vcombine.low %v1220_v35, %v1224_v36  ;;  %v1228_v39 = vld [vmem:[#allocation20 + $0x80] sm:$0xff]  ;;  %v1219_v36 = vld [vmem:[#allocation20 + $0x38] sm:$0xff]  ;;  %p4323_p3 = scmp.ne.s32.totalorder %s5005_s18, %s4322_s17  ;;  %s4439_s8 = smov [#allocation22]  }
 0x195   : > { %3437 = vmatprep.subr.msk.bf16.mxu1 %vm856_vm1, %v3434_v5  ;;  %3765 = vmatprep.subr.bf16.mxu0 %v4436_v0  ;;  %v1232_v40 = vld [vmem:[#allocation20 + $0xa0] sm:$0xff]  ;;  %s4326_s5 = sshll.u32 %s4439_s8, 4  ;;  %s4327_s5 = int_to_ptr.vmem [resolvable:$false] %s4326_s5 }
 0x196   : > { %687 = vperm.xlu1 %3964, %v679_v12   ;;  %v3458_v41 = vcombine.high %v1228_v39, %v1232_v40  ;;  %v3457_v42 = vcombine.low %v1228_v39, %v1232_v40  ;;  %v1222_v40 = vld [vmem:[#allocation20 + $0x50] sm:$0xff]  ;;  %p4324_p4 = pnand %p4323_p3, %p5125_p13  ;;  %s4328_s4 = scalar_lea.vmem %s4327_s5, 2048 }
 0x197   : > { %3762 = vmatmul.mubr.msk.bf16.vlgmr.msra.gmra.mrb[0].mxu1 %vm633_vm2, %v3968_v7  ;;  %3754 = vmatmul.mubr.msk.bf16.vlgmr.msra.gmra.mrb[0].mxu0 %vm633_vm2, %v3970_v8  ;;  %v1213_v8 = vld [vmem:[#allocation20 + $0x8] sm:$0xff]  ;;  %s5003_s0 = scalar_lea.hbm %s5124_s14, %s3740_s12  ;;  %p4329_p5 = scmp.lt.s32.totalorder %s5005_s18, %s4327_s5 }
 0x198   : > { %870 = vmatpush1.bf16.msra.mxu1 %v858_v9  ;;  %901 = vmatprep.mubr.bf16.mxu1 %v4438_v1  ;;  %v1217_v9 = vld [vmem:[#allocation20 + $0x28] sm:$0xff]  ;;  %p4325_p8 = pneg %p4324_p4  ;;  %p4330_p10 = scmp.lt.s32.totalorder %s4328_s4, %s4322_s17 }
 0x199   : > { %3767 = vmatprep.mubr.msk.bf16.mxu0 %vm4437_vm0, %v4436_v0  ;;  %1407 = vmatprep.subr.bf16.mxu1 %v3442_v34  ;;  %v613_v0 = vld [vmem:[%s4889_s29 + $0x8] sm:$0xff]  ;;  %v1215_v34 = vld [vmem:[#allocation20 + $0x18] sm:$0xff] }
 0x19a   : > { %701 = vperm.xlu1 %3964, %v693_v13   ;;  %v3436_v5 = vcombine.high %v613_v0, %v613_v0  ;;  %v3435_v6 = vcombine.low %v613_v0, %v613_v0  ;;  %v3444_v13 = vcombine.high %v1213_v8, %v1217_v9  ;;  %v3448_v39 = vcombine.high %v1215_v34, %v1219_v36  ;;  %v1239_v0 = vld [vmem:[#allocation20 + $0xd8] sm:$0xff]  ;;  %p4331_p1 = por %p4330_p10, %p4329_p5 }
 0x19c   : > { %v864_v12 = vsel %vm856_vm1, %v3435_v6, 0  ;;  %p4332_p11 = pnand %p4331_p1, %p4325_p8 }
 0x19e   : > { %788 = vperm.xlu1 %3964, %v785_v14   ;;  %v1221_v14 = vld [vmem:[#allocation20 + $0x48] sm:$0xff] }
 0x19f   : > { %3438 = vmatmul.mubr.msk.bf16.vlgmr.msra.gmra.mrb[4].mxu1 %vm852_vm3, %v4930_v10 }
 0x1a0   : > { %1439 = vmatprep.mubr.bf16.mxu1 %v4438_v1  ;;  %1408 = vmatpush1.bf16.msra.mxu1 %v3441_v33  ;;  %v1218_v33 = vld [vmem:[#allocation20 + $0x30] sm:$0xff] }
 0x1a1   : > { %1409 = vmatprep.subr.bf16.mxu1 %v3450_v37 }
 0x1a2   : > { %839 = vperm.xlu1 %3964, %v836_v15   ;;  %v1225_v15 = vld [vmem:[#allocation20 + $0x68] sm:$0xff] }
 0x1a4   : > { %1410 = vmatpush1.bf16.msra.mxu1 %v3449_v38  ;;  %v3447_v38 = vcombine.low %v1215_v34, %v1219_v36 }
 0x1a5   : > { %1411 = vmatprep.subr.bf16.mxu1 %v3458_v41 }
 0x1a8   : > { %1412 = vmatpush1.bf16.msra.mxu1 %v3457_v42 }
 0x211   : > { %v683_v49 = vpop.permute.xlu1 %682 }
 0x215   : > { %v688_v54 = vpop.permute.xlu1 %687 }
 0x219   : > { %v702_v58 = vpop.permute.xlu1 %701 }
 0x21d   : > { %v789_v41 = vpop.permute.xlu1 %788 }
 0x26a   : > { %v752_v16 = vpop.f32.mrb[0].mxu1  ;;  %v671_v23 = vpop.f32.mrb[0].mxu0 }
 0x26b   : > { %v3763_v17 = vpop.f32.mrb[1].mxu1  ;;  %v760_v18 = vsel %vm759_vm4, %v752_v16, 0.0  ;;  %v3755_v24 = vpop.f32.mrb[1].mxu0  ;;  %v690_v55 = vmul.f32 %v683_v49, %v671_v23  ;;  %v3443_v16 = vcombine.low %v1213_v8, %v1217_v9  ;;  %v1236_v23 = vld [vmem:[#allocation20 + $0xc0] sm:$0xff] }
 0x26c   : > { %761 = vadd.xlane.f32.xlu0 %v760_v18  ;;  %v755_v19 = vpop.f32.mrb[2].mxu1  ;;  %v674_v25 = vpop.f32.mrb[2].mxu0  ;;  %v3452_v17 = vcombine.high %v1221_v14, %v1225_v15  ;;  %v1229_v18 = vld [vmem:[#allocation20 + $0x88] sm:$0xff]  ;;  %v1240_v24 = vld [vmem:[#allocation20 + $0xe0] sm:$0xff] }
 0x26d   : > { %v3764_v20 = vpop.f32.mrb[3].mxu1  ;;  %v763_v21 = vsel %vm759_vm4, %v755_v19, 0.0  ;;  %v3756_v27 = vpop.f32.mrb[3].mxu0  ;;  %v691_v56 = vmul.f32 %v688_v54, %v674_v25  ;;  %v1233_v19 = vld [vmem:[#allocation20 + $0xa8] sm:$0xff]  ;;  %v1234_v54 = vld [vmem:[#allocation20 + $0xb0] sm:$0xff]  ;;  %v955_v9 = vld [vmem:[#allocation19] sm:$0xff] }
 0x26e   : > { %v3451_v20 = vcombine.low %v1221_v14, %v1225_v15  ;;  %v1237_v25 = vld [vmem:[#allocation20 + $0xc8] sm:$0xff]  ;;  %v3466_v27 = vcombine.high %v1236_v23, %v1240_v24  ;;  %v4960_v15 = vpop.permute.xlu1 %839 }
 0x26f   : > { %v705_v59 = vadd.f32 %v702_v58, %v691_v56  ;;  %v1235_v56 = vld [vmem:[#allocation20 + $0xb8] sm:$0xff]  ;;  %v960_v14 = vld [vmem:[#allocation19 + $0x28] sm:$0xff] }
 0x270   : > { %764 = vadd.xlane.f32.xlu0 %v763_v21  ;;  %v3460_v21 = vcombine.high %v1229_v18, %v1233_v19  ;;  %1413 = vmatprep.subr.bf16.mxu1 %v3466_v27 }
 0x271   : > { %v707_v62 = vmax.f32 %v705_v59, 0.0 }
 0x272   : > { %v4937_v26 = vpop.f32.mrb[4].mxu1 }
 0x273   : > { %v4939_v28 = vpop.f32.mrb[5].mxu1 }
 0x274   : > { %v907_v29 = vpop.f32.mrb[6].mxu1 }
 0x275   : > { %v908_v30 = vpop.f32.mrb[7].mxu1  ;;  %v1241_v29 = vld [vmem:[#allocation20 + $0xe8] sm:$0xff] }
 0x276   : > { %v3465_v30 = vcombine.low %v1236_v23, %v1240_v24  ;;  %v3467_v31 = vcombine.low %v1237_v25, %v1241_v29  ;;  %v3468_v32 = vcombine.high %v1237_v25, %v1241_v29  ;;  %v968_v23 = vld [vmem:[#allocation19 + $0x68] sm:$0xff] }
 0x278   : > { %1414 = vmatpush1.bf16.msra.mxu1 %v3465_v30 }
 0x286   : > { %696 = vperm.xlu0 %3965, %v692_v22   ;;  %v3459_v22 = vcombine.low %v1229_v18, %v1233_v19  ;;  %v906_v19 = vadd.f32 %v4939_v28, %v4960_v15  ;;  %v972_v28 = vld [vmem:[#allocation19 + $0x88] sm:$0xff] }
 0x288   : > { %v4964_v27 = vpack.c.bf16 %v906_v19, %v906_v19  ;;  %v1020_v19 = vld [vmem:[#allocation19 + $0x208] sm:$0xff] }
 0x2f9   : > { %v762_v43 = vpop.xlane.xlu0 %761 }
 0x2fa   : > { %v3430_v44 = vmul.f32 -0.015625, %v762_v43  ;;  %v1226_v43 = vld [vmem:[#allocation20 + $0x70] sm:$0xff] }
 0x2fc   : > { %v771_v45 = vmul.f32 1.442695, %v3430_v44  ;;  %v1223_v44 = vld [vmem:[#allocation20 + $0x58] sm:$0xff] }
 0x2fd   : > { %v765_v46 = vpop.xlane.xlu0 %764 }
 0x2fe   : > { %3974 = vpow2.f32 %v771_v45  ;;  %v3431_v47 = vmul.f32 -0.015625, %v765_v46  ;;  %v1227_v45 = vld [vmem:[#allocation20 + $0x78] sm:$0xff] }
 0x2ff   : > { %v3455_v58 = vcombine.low %v1223_v44, %v1227_v45 }
 0x300   : > { %v773_v48 = vmul.f32 1.442695, %v3431_v47 }
 0x302   : > { %3976 = vpow2.f32 %v773_v48 }
 0x305   : > { %v697_v57 = vpop.permute.xlu0 %696 }
 0x306   : > { %v704_v60 = vadd.f32 %v697_v57, %v690_v55  ;;  %v1231_v55 = vld [vmem:[#allocation20 + $0x98] sm:$0xff]  ;;  %v3453_v57 = vcombine.low %v1222_v40, %v1226_v43 }
 0x308   : > { %v3975_v50 = vpop.eup %3974  ;;  %v706_v63 = vmax.f32 %v704_v60, 0.0  ;;  %v3464_v60 = vcombine.high %v1231_v55, %v1235_v56 }
 0x309   : > { %v775_v51 = vadd.f32 1.0, %v3975_v50 }
 0x30b   : > { %3978 = vrcp.f32 %v775_v51  ;;  %v3454_v51 = vcombine.high %v1222_v40, %v1226_v43  ;;  %v984_v40 = vld [vmem:[#allocation19 + $0xe8] sm:$0xff] }
 0x30c   : > { %v3977_v52 = vpop.eup %3976 }
 0x30d   : > { %v776_v53 = vadd.f32 1.0, %v3977_v52  ;;  %v3456_v52 = vcombine.high %v1223_v44, %v1227_v45  ;;  %v987_v45 = vld [vmem:[#allocation19 + $0x100] sm:$0xff] }
 0x30f   : > { %3980 = vrcp.f32 %v776_v53  ;;  %v1230_v53 = vld [vmem:[#allocation20 + $0x90] sm:$0xff] }
 0x310   : > { %v3462_v59 = vcombine.high %v1230_v53, %v1234_v54 }
 0x315   : > { %v3979_v61 = vpop.eup %3978 }
 0x316   : > { %v781_v4 = vmul.f32 %v3979_v61, %v706_v63  ;;  %v1238_v61 = vld [vmem:[#allocation20 + $0xd0] sm:$0xff] }
 0x317   : > { %v1242_v63 = vld [vmem:[#allocation20 + $0xf0] sm:$0xff] }
 0x319   : > { %v3981_v2 = vpop.eup %3980 }
 0x31a   : > { %v782_v3 = vmul.f32 %v3981_v2, %v707_v62  ;;  %v1243_v2 = vld [vmem:[#allocation20 + $0xf8] sm:$0xff] }
 0x31b   : > { %v3472_v8 = vcombine.high %v1239_v0, %v1243_v2 }
 0x31c   : > { %v784_v7 = vpack.c.bf16 %v782_v3, %v781_v4  ;;  %v3461_v4 = vcombine.low %v1230_v53, %v1234_v54  ;;  %v995_v53 = vld [vmem:[#allocation19 + $0x140] sm:$0xff] }
 0x31d   : > { %v999_v54 = vld [vmem:[#allocation19 + $0x160] sm:$0xff] }
 0x31e   : > { %3766 = vmatpush3.bf16.msra.mxu0 %v784_v7  ;;  %v3470_v7 = vcombine.high %v1238_v61, %v1242_v63 }
 0x31f   : > { %3439 = vmatprep.subr.msk.bf16.mxu0 %vm856_vm1, %v3436_v5  ;;  %v3463_v5 = vcombine.low %v1231_v55, %v1235_v56  ;;  %v996_v55 = vld [vmem:[#allocation19 + $0x148] sm:$0xff] }
 0x320   : > { %v1000_v56 = vld [vmem:[#allocation19 + $0x168] sm:$0xff] }
 0x321   : > { %3768 = vmatmul.mubr.msk.bf16.vlgmr.msra.gmra.mrb[4].mxu0 %vm791_vm5, %v783_v11 }
 0x322   : > { %911 = vmatpush1.bf16.msra.mxu0 %v864_v12  ;;  %942 = vmatprep.mubr.bf16.mxu0 %v4438_v1  ;;  %v959_v12 = vld [vmem:[#allocation19 + $0x20] sm:$0xff] }
 0x323   : > { %1448 = vmatprep.subr.bf16.mxu0 %v3444_v13  ;;  %v956_v13 = vld [vmem:[#allocation19 + $0x8] sm:$0xff]  ;;  %v3477_v24 = vcombine.low %v955_v9, %v959_v12 }
 0x324   : > { %v3480_v18 = vcombine.high %v956_v13, %v960_v14  ;;  %v3479_v25 = vcombine.low %v956_v13, %v960_v14 }
 0x329   : > { %3440 = vmatmul.mubr.msk.bf16.vlgmr.msra.gmra.mrb[8].mxu0 %vm852_vm3, %v4930_v10  ;;  %v1214_v10 = vld [vmem:[#allocation20 + $0x10] sm:$0xff] }
 0x32a   : > { %1449 = vmatpush1.bf16.msra.mxu0 %v3443_v16  ;;  %1480 = vmatprep.mubr.bf16.mxu0 %v4438_v1  ;;  %v3446_v35 = vcombine.high %v1214_v10, %v1218_v33  ;;  %v3445_v37 = vcombine.low %v1214_v10, %v1218_v33  ;;  %v3471_v16 = vcombine.low %v1239_v0, %v1243_v2  ;;  %v976_v10 = vld [vmem:[#allocation19 + $0xa8] sm:$0xff] }
 0x32b   : > { %1450 = vmatprep.subr.bf16.mxu0 %v3452_v17  ;;  %v3478_v17 = vcombine.high %v955_v9, %v959_v12  ;;  %v3496_v36 = vcombine.high %v972_v28, %v976_v10  ;;  %v1004_v0 = vld [vmem:[#allocation19 + $0x188] sm:$0xff]  ;;  %v1015_v9 = vld [vmem:[#allocation19 + $0x1e0] sm:$0xff] }
 0x32c   : > { %1489 = vmatprep.subr.bf16.mxu1 %v3446_v35  ;;  %v1008_v2 = vld [vmem:[#allocation19 + $0x1a8] sm:$0xff] }
 0x32d   : > { %v1016_v12 = vld [vmem:[#allocation19 + $0x1e8] sm:$0xff]  ;;  %v3527_v14 = vcombine.low %v1004_v0, %v1008_v2 }
 0x32e   : > { %1451 = vmatpush1.bf16.msra.mxu0 %v3451_v20  ;;  %v963_v20 = vld [vmem:[#allocation19 + $0x40] sm:$0xff] }
 0x32f   : > { %1452 = vmatprep.subr.bf16.mxu0 %v3460_v21  ;;  %v967_v21 = vld [vmem:[#allocation19 + $0x60] sm:$0xff] }
 0x330   : > { %v3486_v29 = vcombine.high %v963_v20, %v967_v21  ;;  %v3485_v33 = vcombine.low %v963_v20, %v967_v21  ;;  %v1024_v20 = vld [vmem:[#allocation19 + $0x228] sm:$0xff] }
 0x332   : > { %1453 = vmatpush1.bf16.msra.mxu0 %v3459_v22  ;;  %v964_v22 = vld [vmem:[#allocation19 + $0x48] sm:$0xff] }
 0x333   : > { %1454 = vmatprep.subr.bf16.mxu0 %v3468_v32  ;;  %v3488_v30 = vcombine.high %v964_v22, %v968_v23  ;;  %v975_v32 = vld [vmem:[#allocation19 + $0xa0] sm:$0xff]  ;;  %v3487_v34 = vcombine.low %v964_v22, %v968_v23 }
 0x336   : > { %1455 = vmatpush1.bf16.msra.mxu0 %v3467_v31  ;;  %v971_v31 = vld [vmem:[#allocation19 + $0x80] sm:$0xff] }
 0x337   : > { %1530 = vmatprep.subr.bf16.mxu0 %v3448_v39  ;;  %v3494_v35 = vcombine.high %v971_v31, %v975_v32  ;;  %v980_v39 = vld [vmem:[#allocation19 + $0xc8] sm:$0xff] }
 0x338   : > { %v3504_v44 = vcombine.high %v980_v39, %v984_v40 }
 0x3f4   : > { %v829_v42 = vpop.f32.mrb[4].mxu0 }
 0x3f5   : > { %v830_v46 = vadd.f32 %v829_v42, %v789_v41  ;;  %v3769_v47 = vpop.f32.mrb[5].mxu0  ;;  %v3493_v41 = vcombine.low %v971_v31, %v975_v32  ;;  %v3495_v42 = vcombine.low %v972_v28, %v976_v10  ;;  %v1032_v31 = vld [vmem:[#allocation19 + $0x268] sm:$0xff]  ;;  %v3543_v28 = vcombine.low %v1020_v19, %v1024_v20 }
 0x3f6   : > { %v832_v48 = vpop.f32.mrb[6].mxu0  ;;  %v988_v47 = vld [vmem:[#allocation19 + $0x108] sm:$0xff] }
 0x3f7   : > { %v4948_v49 = vpack.c.bf16 %v830_v46, %v830_v46  ;;  %v3770_v50 = vpop.f32.mrb[7].mxu0  ;;  %v991_v46 = vld [vmem:[#allocation19 + $0x120] sm:$0xff]  ;;  %v992_v48 = vld [vmem:[#allocation19 + $0x128] sm:$0xff] }
 0x3f8   : > { %v3503_v50 = vcombine.low %v980_v39, %v984_v40 }
 0x3f9   : > { %3473 = vmatmul.mubr.msk.bf16.vlgmr.msra.gmra.mrb[8].mxu1 %vm759_vm4, %v4948_v49  ;;  %3474 = vmatmul.mubr.msk.bf16.vlgmr.msra.gmra.mrb[12].mxu0 %vm759_vm4, %v4948_v49 }
 0x3fa   : > { %1490 = vmatpush1.bf16.msra.mxu1 %v3445_v37  ;;  %1531 = vmatpush1.bf16.msra.mxu0 %v3447_v38  ;;  %v979_v37 = vld [vmem:[#allocation19 + $0xc0] sm:$0xff] }
 0x3fb   : > { %1491 = vmatprep.subr.bf16.mxu1 %v3454_v51  ;;  %1532 = vmatprep.subr.bf16.mxu0 %v3456_v52  ;;  %v983_v38 = vld [vmem:[#allocation19 + $0xe0] sm:$0xff]  ;;  %v3510_v51 = vcombine.high %v987_v45, %v991_v46  ;;  %v3512_v52 = vcombine.high %v988_v47, %v992_v48 }
 0x3fc   : > { %v4954_v62 = vpop.f32.mrb[8].mxu0  ;;  %1521 = vmatprep.mubr.bf16.mxu1 %v4438_v1  ;;  %1562 = vmatprep.mubr.bf16.mxu0 %v4438_v1  ;;  %v3469_v1 = vcombine.low %v1238_v61, %v1242_v63  ;;  %v3502_v43 = vcombine.high %v979_v37, %v983_v38  ;;  %v1003_v61 = vld [vmem:[#allocation19 + $0x180] sm:$0xff] }
 0x3fd   : > { %v4958_v3 = vpop.f32.mrb[9].mxu0  ;;  %v1007_v63 = vld [vmem:[#allocation19 + $0x1a0] sm:$0xff] }
 0x3fe   : > { %1492 = vmatpush1.bf16.msra.mxu1 %v3453_v57  ;;  %1533 = vmatpush1.bf16.msra.mxu0 %v3455_v58  ;;  %v948_v6 = vpop.f32.mrb[10].mxu0  ;;  %v3509_v57 = vcombine.low %v987_v45, %v991_v46  ;;  %v3511_v58 = vcombine.low %v988_v47, %v992_v48  ;;  %v3525_v13 = vcombine.low %v1003_v61, %v1007_v63  ;;  %v1048_v45 = vld [vmem:[#allocation19 + $0x2e8] sm:$0xff] }
 0x3ff   : > { %1493 = vmatprep.subr.bf16.mxu1 %v3462_v59  ;;  %1534 = vmatprep.subr.bf16.mxu0 %v3464_v60  ;;  %v949_v11 = vpop.f32.mrb[11].mxu0  ;;  %v3518_v59 = vcombine.high %v995_v53, %v999_v54  ;;  %v3520_v60 = vcombine.high %v996_v55, %v1000_v56  ;;  %v3526_v6 = vcombine.high %v1003_v61, %v1007_v63  ;;  %v1064_v61 = vld [vmem:[#allocation19 + $0x368] sm:$0xff] }
 0x400   : > { %v1012_v11 = vld [vmem:[#allocation19 + $0x1c8] sm:$0xff] }
 0x401   : > { %v3535_v22 = vcombine.low %v1012_v11, %v1016_v12 }
 0x402   : > { %1494 = vmatpush1.bf16.msra.mxu1 %v3461_v4  ;;  %1535 = vmatpush1.bf16.msra.mxu0 %v3463_v5  ;;  %v3517_v4 = vcombine.low %v995_v53, %v999_v54  ;;  %v3519_v5 = vcombine.low %v996_v55, %v1000_v56  ;;  %v1056_v53 = vld [vmem:[#allocation19 + $0x328] sm:$0xff] }
 0x403   : > { %1495 = vmatprep.subr.bf16.mxu1 %v3470_v7  ;;  %1536 = vmatprep.subr.bf16.mxu0 %v3472_v8  ;;  %v3528_v7 = vcombine.high %v1004_v0, %v1008_v2  ;;  %v1011_v8 = vld [vmem:[#allocation19 + $0x1c0] sm:$0xff] }
 0x404   : > { %v3533_v21 = vcombine.low %v1011_v8, %v1015_v9 }
 0x406   : > { %1496 = vmatpush1.bf16.msra.mxu1 %v3469_v1  ;;  %1537 = vmatpush1.bf16.msra.mxu0 %v3471_v16  ;;  %v3534_v1 = vcombine.high %v1011_v8, %v1015_v9  ;;  %v3536_v16 = vcombine.high %v1012_v11, %v1016_v12  ;;  %v1072_v8 = vld [vmem:[#allocation19 + $0x3a8] sm:$0xff] }
 0x407   : > { %2851 = vmatprep.subr.bf16.mxu1 %v3478_v17  ;;  %2933 = vmatprep.subr.bf16.mxu0 %v3480_v18  ;;  %v1019_v17 = vld [vmem:[#allocation19 + $0x200] sm:$0xff] }
 0x408   : > { %v1023_v18 = vld [vmem:[#allocation19 + $0x220] sm:$0xff] }
 0x409   : > { %3475 = vmatmul.mubr.msk.bf16.vlgmr.msra.gmra.mrb[12].mxu1 %vm759_vm4, %v4948_v49  ;;  %3476 = vmatmul.mubr.msk.bf16.vlgmr.msra.gmra.mrb[16].mxu0 %vm759_vm4, %v4948_v49  ;;  %v3501_v49 = vcombine.low %v979_v37, %v983_v38  ;;  %v3542_v23 = vcombine.high %v1019_v17, %v1023_v18  ;;  %v3541_v32 = vcombine.low %v1019_v17, %v1023_v18  ;;  %v1040_v37 = vld [vmem:[#allocation19 + $0x2a8] sm:$0xff] }
 0x40a   : > { %2852 = vmatpush1.bf16.msra.mxu1 %v3477_v24  ;;  %2883 = vmatprep.mubr.bf16.mxu1 %v4964_v27  ;;  %v3544_v24 = vcombine.high %v1020_v19, %v1024_v20  ;;  %v1080_v17 = vld [vmem:[#allocation19 + $0x3e8] sm:$0xff] }
 0x40b   : > { %2934 = vmatpush1.bf16.msra.mxu0 %v3479_v25  ;;  %2965 = vmatprep.mubr.bf16.mxu0 %v4964_v27  ;;  %v1027_v25 = vld [vmem:[#allocation19 + $0x240] sm:$0xff] }
 0x40c   : > { %2853 = vmatprep.subr.bf16.mxu1 %v3486_v29  ;;  %2935 = vmatprep.subr.bf16.mxu0 %v3488_v30  ;;  %v1031_v29 = vld [vmem:[#allocation19 + $0x260] sm:$0xff]  ;;  %v1028_v30 = vld [vmem:[#allocation19 + $0x248] sm:$0xff] }
 0x40d   : > { %v3550_v10 = vcombine.high %v1027_v25, %v1031_v29  ;;  %v3549_v38 = vcombine.low %v1027_v25, %v1031_v29  ;;  %v3551_v39 = vcombine.low %v1028_v30, %v1032_v31  ;;  %v1088_v25 = vld [vmem:[#allocation19 + $0x428] sm:$0xff] }
 0x40e   : > { %2854 = vmatpush1.bf16.msra.mxu1 %v3485_v33  ;;  %v3552_v33 = vcombine.high %v1028_v30, %v1032_v31  ;;  %v904_v30 = vadd.f32 %v4937_v26, %v4960_v15 }
 0x40f   : > { %2936 = vmatpush1.bf16.msra.mxu0 %v3487_v34  ;;  %2855 = vmatprep.subr.bf16.mxu1 %v3494_v35  ;;  %v1035_v34 = vld [vmem:[#allocation19 + $0x280] sm:$0xff] }
 0x410   : > { %2937 = vmatprep.subr.bf16.mxu0 %v3496_v36  ;;  %v1039_v35 = vld [vmem:[#allocation19 + $0x2a0] sm:$0xff]  ;;  %v1036_v36 = vld [vmem:[#allocation19 + $0x288] sm:$0xff] }
 0x411   : > { %v3558_v40 = vcombine.high %v1035_v34, %v1039_v35  ;;  %v3557_v46 = vcombine.low %v1035_v34, %v1039_v35  ;;  %v3559_v47 = vcombine.low %v1036_v36, %v1040_v37  ;;  %v1095_v34 = vld [vmem:[#allocation19 + $0x460] sm:$0xff] }
 0x412   : > { %2856 = vmatpush1.bf16.msra.mxu1 %v3493_v41  ;;  %v3560_v41 = vcombine.high %v1036_v36, %v1040_v37  ;;  %v1092_v36 = vld [vmem:[#allocation19 + $0x448] sm:$0xff] }
 0x413   : > { %2938 = vmatpush1.bf16.msra.mxu0 %v3495_v42  ;;  %2857 = vmatprep.subr.bf16.mxu1 %v3502_v43  ;;  %v1043_v42 = vld [vmem:[#allocation19 + $0x2c0] sm:$0xff]  ;;  %v1096_v37 = vld [vmem:[#allocation19 + $0x468] sm:$0xff] }
 0x414   : > { %2939 = vmatprep.subr.bf16.mxu0 %v3504_v44  ;;  %v1047_v43 = vld [vmem:[#allocation19 + $0x2e0] sm:$0xff]  ;;  %v1044_v44 = vld [vmem:[#allocation19 + $0x2c8] sm:$0xff] }
 0x415   : > { %v3566_v48 = vcombine.high %v1043_v42, %v1047_v43  ;;  %v3565_v54 = vcombine.low %v1043_v42, %v1047_v43  ;;  %v3567_v55 = vcombine.low %v1044_v44, %v1048_v45  ;;  %v1100_v43 = vld [vmem:[#allocation19 + $0x488] sm:$0xff] }
 0x416   : > { %2858 = vmatpush1.bf16.msra.mxu1 %v3501_v49  ;;  %v3568_v49 = vcombine.high %v1044_v44, %v1048_v45  ;;  %v1104_v44 = vld [vmem:[#allocation19 + $0x4a8] sm:$0xff] }
 0x417   : > { %2940 = vmatpush1.bf16.msra.mxu0 %v3503_v50  ;;  %2859 = vmatprep.subr.bf16.mxu1 %v3510_v51  ;;  %v1051_v50 = vld [vmem:[#allocation19 + $0x300] sm:$0xff] }
 0x418   : > { %2941 = vmatprep.subr.bf16.mxu0 %v3512_v52  ;;  %v1055_v51 = vld [vmem:[#allocation19 + $0x320] sm:$0xff]  ;;  %v1052_v52 = vld [vmem:[#allocation19 + $0x308] sm:$0xff] }
 0x419   : > { %v3574_v56 = vcombine.high %v1051_v50, %v1055_v51  ;;  %v3573_v63 = vcombine.low %v1051_v50, %v1055_v51  ;;  %v3575_v0 = vcombine.low %v1052_v52, %v1056_v53  ;;  %v1111_v50 = vld [vmem:[#allocation19 + $0x4e0] sm:$0xff]  ;;  %v1108_v51 = vld [vmem:[#allocation19 + $0x4c8] sm:$0xff] }
 0x41a   : > { %2860 = vmatpush1.bf16.msra.mxu1 %v3509_v57  ;;  %v3576_v57 = vcombine.high %v1052_v52, %v1056_v53  ;;  %v1112_v52 = vld [vmem:[#allocation19 + $0x4e8] sm:$0xff] }
 0x41b   : > { %2942 = vmatpush1.bf16.msra.mxu0 %v3511_v58  ;;  %2861 = vmatprep.subr.bf16.mxu1 %v3518_v59  ;;  %v1059_v58 = vld [vmem:[#allocation19 + $0x340] sm:$0xff] }
 0x41c   : > { %2943 = vmatprep.subr.bf16.mxu0 %v3520_v60  ;;  %v1063_v59 = vld [vmem:[#allocation19 + $0x360] sm:$0xff]  ;;  %v1060_v60 = vld [vmem:[#allocation19 + $0x348] sm:$0xff] }
 0x41d   : > { %v3582_v2 = vcombine.high %v1059_v58, %v1063_v59  ;;  %v3581_v9 = vcombine.low %v1059_v58, %v1063_v59  ;;  %v3583_v11 = vcombine.low %v1060_v60, %v1064_v61  ;;  %v1119_v58 = vld [vmem:[#allocation19 + $0x520] sm:$0xff]  ;;  %v1116_v59 = vld [vmem:[#allocation19 + $0x508] sm:$0xff] }
 0x41e   : > { %2862 = vmatpush1.bf16.msra.mxu1 %v3517_v4  ;;  %v3584_v4 = vcombine.high %v1060_v60, %v1064_v61  ;;  %v1120_v60 = vld [vmem:[#allocation19 + $0x528] sm:$0xff] }
 0x41f   : > { %2944 = vmatpush1.bf16.msra.mxu0 %v3519_v5  ;;  %2863 = vmatprep.subr.bf16.mxu1 %v3526_v6  ;;  %v1067_v5 = vld [vmem:[#allocation19 + $0x380] sm:$0xff] }
 0x420   : > { %2945 = vmatprep.subr.bf16.mxu0 %v3528_v7  ;;  %v1071_v6 = vld [vmem:[#allocation19 + $0x3a0] sm:$0xff]  ;;  %v1068_v7 = vld [vmem:[#allocation19 + $0x388] sm:$0xff] }
 0x421   : > { %v3590_v12 = vcombine.high %v1067_v5, %v1071_v6  ;;  %v3589_v18 = vcombine.low %v1067_v5, %v1071_v6  ;;  %v3591_v19 = vcombine.low %v1068_v7, %v1072_v8  ;;  %v1127_v5 = vld [vmem:[#allocation19 + $0x560] sm:$0xff]  ;;  %v1124_v6 = vld [vmem:[#allocation19 + $0x548] sm:$0xff] }
 0x422   : > { %2864 = vmatpush1.bf16.msra.mxu1 %v3525_v13  ;;  %v3592_v13 = vcombine.high %v1068_v7, %v1072_v8  ;;  %v1128_v7 = vld [vmem:[#allocation19 + $0x568] sm:$0xff] }
 0x423   : > { %2946 = vmatpush1.bf16.msra.mxu0 %v3527_v14  ;;  %2865 = vmatprep.subr.bf16.mxu1 %v3534_v1  ;;  %v1075_v14 = vld [vmem:[#allocation19 + $0x3c0] sm:$0xff] }
 0x424   : > { %2947 = vmatprep.subr.bf16.mxu0 %v3536_v16  ;;  %v1079_v1 = vld [vmem:[#allocation19 + $0x3e0] sm:$0xff]  ;;  %v1076_v16 = vld [vmem:[#allocation19 + $0x3c8] sm:$0xff] }
 0x425   : > { %v3598_v20 = vcombine.high %v1075_v14, %v1079_v1  ;;  %v3597_v29 = vcombine.low %v1075_v14, %v1079_v1  ;;  %v3599_v31 = vcombine.low %v1076_v16, %v1080_v17  ;;  %v1135_v14 = vld [vmem:[#allocation19 + $0x5a0] sm:$0xff]  ;;  %v1132_v1 = vld [vmem:[#allocation19 + $0x588] sm:$0xff] }
 0x426   : > { %2866 = vmatpush1.bf16.msra.mxu1 %v3533_v21  ;;  %v3600_v21 = vcombine.high %v1076_v16, %v1080_v17  ;;  %v1136_v16 = vld [vmem:[#allocation19 + $0x5a8] sm:$0xff] }
 0x427   : > { %2948 = vmatpush1.bf16.msra.mxu0 %v3535_v22  ;;  %2867 = vmatprep.subr.bf16.mxu1 %v3542_v23  ;;  %v1083_v22 = vld [vmem:[#allocation19 + $0x400] sm:$0xff] }
 0x428   : > { %2949 = vmatprep.subr.bf16.mxu0 %v3544_v24  ;;  %v1087_v23 = vld [vmem:[#allocation19 + $0x420] sm:$0xff]  ;;  %v1084_v24 = vld [vmem:[#allocation19 + $0x408] sm:$0xff] }
 0x429   : > { %v3605_v35 = vcombine.low %v1083_v22, %v1087_v23  ;;  %v3607_v26 = vcombine.low %v1084_v24, %v1088_v25 }
 0x42a   : > { %2868 = vmatpush1.bf16.msra.mxu1 %v3541_v32  ;;  %v3606_v32 = vcombine.high %v1083_v22, %v1087_v23  ;;  %v1143_v22 = vld [vmem:[#allocation19 + $0x5e0] sm:$0xff]  ;;  %v1140_v23 = vld [vmem:[#allocation19 + $0x5c8] sm:$0xff] }
 0x42b   : > { %2950 = vmatpush1.bf16.msra.mxu0 %v3543_v28  ;;  %2869 = vmatprep.subr.bf16.mxu1 %v3550_v10  ;;  %v3608_v28 = vcombine.high %v1084_v24, %v1088_v25  ;;  %v947_v10 = vadd.f32 %v4958_v3, %v4960_v15  ;;  %v3616_v3 = vcombine.high %v1092_v36, %v1096_v37  ;;  %v1144_v24 = vld [vmem:[#allocation19 + $0x5e8] sm:$0xff] }
 0x42c   : > { %2951 = vmatprep.subr.bf16.mxu0 %v3552_v33  ;;  %v1091_v33 = vld [vmem:[#allocation19 + $0x440] sm:$0xff] }
 0x42d   : > { %v4978_v42 = vpack.c.bf16 %v947_v10, %v947_v10  ;;  %v3613_v45 = vcombine.low %v1091_v33, %v1095_v34  ;;  %v1148_v10 = vld [vmem:[#allocation19 + $0x608] sm:$0xff] }
 0x42e   : > { %2870 = vmatpush1.bf16.msra.mxu1 %v3549_v38  ;;  %v4976_v38 = vpack.c.bf16 %v904_v30, %v904_v30 }
 0x42f   : > { %2952 = vmatpush1.bf16.msra.mxu0 %v3551_v39  ;;  %2871 = vmatprep.subr.bf16.mxu1 %v3558_v40  ;;  %v3614_v39 = vcombine.high %v1091_v33, %v1095_v34  ;;  %v1099_v40 = vld [vmem:[#allocation19 + $0x480] sm:$0xff]  ;;  %v1152_v33 = vld [vmem:[#allocation19 + $0x628] sm:$0xff] }
 0x430   : > { %2953 = vmatprep.subr.bf16.mxu0 %v3560_v41  ;;  %v1103_v41 = vld [vmem:[#allocation19 + $0x4a0] sm:$0xff] }
 0x431   : > { %v3621_v53 = vcombine.low %v1099_v40, %v1103_v41 }
 0x432   : > { %2872 = vmatpush1.bf16.msra.mxu1 %v3557_v46  ;;  %v3615_v46 = vcombine.low %v1092_v36, %v1096_v37  ;;  %v3672_v37 = vcombine.high %v1148_v10, %v1152_v33 }
 0x433   : > { %2954 = vmatpush1.bf16.msra.mxu0 %v3559_v47  ;;  %2873 = vmatprep.subr.bf16.mxu1 %v3566_v48  ;;  %v3622_v47 = vcombine.high %v1099_v40, %v1103_v41  ;;  %v3624_v48 = vcombine.high %v1100_v43, %v1104_v44  ;;  %v1156_v40 = vld [vmem:[#allocation19 + $0x648] sm:$0xff] }
 0x434   : > { %2955 = vmatprep.subr.bf16.mxu0 %v3568_v49  ;;  %v1107_v49 = vld [vmem:[#allocation19 + $0x4c0] sm:$0xff]  ;;  %v1160_v41 = vld [vmem:[#allocation19 + $0x668] sm:$0xff] }
 0x435   : > { %v3629_v61 = vcombine.low %v1107_v49, %v1111_v50 }
 0x436   : > { %2874 = vmatpush1.bf16.msra.mxu1 %v3565_v54  ;;  %v3623_v54 = vcombine.low %v1100_v43, %v1104_v44  ;;  %v3671_v43 = vcombine.low %v1148_v10, %v1152_v33 }
 0x437   : > { %2956 = vmatpush1.bf16.msra.mxu0 %v3567_v55  ;;  %2875 = vmatprep.subr.bf16.mxu1 %v3574_v56  ;;  %v3630_v55 = vcombine.high %v1107_v49, %v1111_v50  ;;  %v3632_v56 = vcombine.high %v1108_v51, %v1112_v52  ;;  %v1168_v49 = vld [vmem:[#allocation19 + $0x6a8] sm:$0xff] }
 0x438   : > { %2957 = vmatprep.subr.bf16.mxu0 %v3576_v57  ;;  %v1115_v57 = vld [vmem:[#allocation19 + $0x500] sm:$0xff] }
 0x439   : > { %v3637_v8 = vcombine.low %v1115_v57, %v1119_v58 }
 0x43a   : > { %2876 = vmatpush1.bf16.msra.mxu1 %v3573_v63  ;;  %v3631_v63 = vcombine.low %v1108_v51, %v1112_v52  ;;  %v3679_v51 = vcombine.low %v1156_v40, %v1160_v41 }
 0x43b   : > { %2958 = vmatpush1.bf16.msra.mxu0 %v3575_v0  ;;  %2877 = vmatprep.subr.bf16.mxu1 %v3582_v2  ;;  %v3638_v0 = vcombine.high %v1115_v57, %v1119_v58  ;;  %v3640_v2 = vcombine.high %v1116_v59, %v1120_v60  ;;  %v1176_v57 = vld [vmem:[#allocation19 + $0x6e8] sm:$0xff] }
 0x43c   : > { %2959 = vmatprep.subr.bf16.mxu0 %v3584_v4  ;;  %v1123_v4 = vld [vmem:[#allocation19 + $0x540] sm:$0xff] }
 0x43d   : > { %v3645_v17 = vcombine.low %v1123_v4, %v1127_v5 }
 0x43e   : > { %2878 = vmatpush1.bf16.msra.mxu1 %v3581_v9  ;;  %v3639_v9 = vcombine.low %v1116_v59, %v1120_v60 }
 0x43f   : > { %2960 = vmatpush1.bf16.msra.mxu0 %v3583_v11  ;;  %2879 = vmatprep.subr.bf16.mxu1 %v3590_v12  ;;  %v3646_v11 = vcombine.high %v1123_v4, %v1127_v5  ;;  %v3648_v12 = vcombine.high %v1124_v6, %v1128_v7  ;;  %v1184_v4 = vld [vmem:[#allocation19 + $0x728] sm:$0xff] }
 0x440   : > { %2961 = vmatprep.subr.bf16.mxu0 %v3592_v13  ;;  %v1131_v13 = vld [vmem:[#allocation19 + $0x580] sm:$0xff] }
 0x441   : > { %v3653_v25 = vcombine.low %v1131_v13, %v1135_v14 }
 0x442   : > { %2880 = vmatpush1.bf16.msra.mxu1 %v3589_v18  ;;  %v3647_v18 = vcombine.low %v1124_v6, %v1128_v7 }
 0x443   : > { %2962 = vmatpush1.bf16.msra.mxu0 %v3591_v19  ;;  %2881 = vmatprep.subr.bf16.mxu1 %v3598_v20  ;;  %v3654_v19 = vcombine.high %v1131_v13, %v1135_v14  ;;  %v3656_v20 = vcombine.high %v1132_v1, %v1136_v16  ;;  %v1192_v13 = vld [vmem:[#allocation19 + $0x768] sm:$0xff] }
 0x444   : > { %2963 = vmatprep.subr.bf16.mxu0 %v3600_v21  ;;  %v1139_v21 = vld [vmem:[#allocation19 + $0x5c0] sm:$0xff] }
 0x445   : > { %v3662_v30 = vcombine.high %v1139_v21, %v1143_v22  ;;  %v3661_v34 = vcombine.low %v1139_v21, %v1143_v22  ;;  %v1200_v21 = vld [vmem:[#allocation19 + $0x7a8] sm:$0xff] }
 0x446   : > { %2882 = vmatpush1.bf16.msra.mxu1 %v3597_v29  ;;  %v3655_v29 = vcombine.low %v1132_v1, %v1136_v16 }
 0x447   : > { %2964 = vmatpush1.bf16.msra.mxu0 %v3599_v31  ;;  %2892 = vmatprep.subr.bf16.mxu1 %v3606_v32  ;;  %v3664_v31 = vcombine.high %v1140_v23, %v1144_v24  ;;  %v1147_v32 = vld [vmem:[#allocation19 + $0x600] sm:$0xff] }
 0x448   : > { %2974 = vmatprep.subr.bf16.mxu0 %v3608_v28  ;;  %v1151_v28 = vld [vmem:[#allocation19 + $0x620] sm:$0xff] }
 0x449   : > { %2884 = vmatmul.mubr.bf16.vlgmr.msra.gmra.mrb[8].mxu1 %v4976_v38  ;;  %v3670_v36 = vcombine.high %v1147_v32, %v1151_v28 }
 0x44a   : > { %2966 = vmatmul.mubr.bf16.vlgmr.msra.gmra.mrb[12].mxu0 %v4976_v38  ;;  %2893 = vmatpush1.bf16.msra.mxu1 %v3605_v35  ;;  %v3663_v35 = vcombine.low %v1140_v23, %v1144_v24 }
 0x44b   : > { %2924 = vmatprep.mubr.bf16.mxu1 %v4978_v42  ;;  %2975 = vmatpush1.bf16.msra.mxu0 %v3607_v26  ;;  %v1155_v26 = vld [vmem:[#allocation19 + $0x640] sm:$0xff] }
 0x44c   : > { %3006 = vmatprep.mubr.bf16.mxu0 %v4978_v42  ;;  %2894 = vmatprep.subr.bf16.mxu1 %v3614_v39  ;;  %v1159_v39 = vld [vmem:[#allocation19 + $0x660] sm:$0xff] }
 0x44d   : > { %2976 = vmatprep.subr.bf16.mxu0 %v3616_v3  ;;  %v3669_v3 = vcombine.low %v1147_v32, %v1151_v28  ;;  %v3678_v44 = vcombine.high %v1155_v26, %v1159_v39  ;;  %v3677_v50 = vcombine.low %v1155_v26, %v1159_v39  ;;  %v1208_v32 = vld [vmem:[#allocation19 + $0x7e8] sm:$0xff]  ;;  %v962_v26 = vld [vmem:[#allocation19 + $0x38] sm:$0xff] }
 0x44e   : > { %2895 = vmatpush1.bf16.msra.mxu1 %v3613_v45  ;;  %v3680_v45 = vcombine.high %v1156_v40, %v1160_v41  ;;  %v945_v40 = vadd.f32 %v4954_v62, %v4960_v15  ;;  %v973_v62 = vld [vmem:[#allocation19 + $0x90] sm:$0xff] }
 0x44f   : > { %2977 = vmatpush1.bf16.msra.mxu0 %v3615_v46  ;;  %2896 = vmatprep.subr.bf16.mxu1 %v3622_v47  ;;  %v1163_v46 = vld [vmem:[#allocation19 + $0x680] sm:$0xff]  ;;  %v977_v15 = vld [vmem:[#allocation19 + $0xb0] sm:$0xff] }
 0x450   : > { %2978 = vmatprep.subr.bf16.mxu0 %v3624_v48  ;;  %v1167_v47 = vld [vmem:[#allocation19 + $0x6a0] sm:$0xff]  ;;  %v1164_v48 = vld [vmem:[#allocation19 + $0x688] sm:$0xff] }
 0x451   : > { %v3686_v52 = vcombine.high %v1163_v46, %v1167_v47  ;;  %v3685_v58 = vcombine.low %v1163_v46, %v1167_v47  ;;  %v3687_v59 = vcombine.low %v1164_v48, %v1168_v49  ;;  %v966_v47 = vld [vmem:[#allocation19 + $0x58] sm:$0xff] }
 0x452   : > { %2897 = vmatpush1.bf16.msra.mxu1 %v3621_v53  ;;  %v3688_v53 = vcombine.high %v1164_v48, %v1168_v49  ;;  %v970_v48 = vld [vmem:[#allocation19 + $0x78] sm:$0xff]  ;;  %v4986_v49 = vpack.c.bf16 %v945_v40, %v945_v40  ;;  %v1025_v40 = vld [vmem:[#allocation19 + $0x230] sm:$0xff] }
 0x453   : > { %2979 = vmatpush1.bf16.msra.mxu0 %v3623_v54  ;;  %2898 = vmatprep.subr.bf16.mxu1 %v3630_v55  ;;  %v1171_v54 = vld [vmem:[#allocation19 + $0x6c0] sm:$0xff] }
 0x454   : > { %2980 = vmatprep.subr.bf16.mxu0 %v3632_v56  ;;  %v1175_v55 = vld [vmem:[#allocation19 + $0x6e0] sm:$0xff]  ;;  %v1172_v56 = vld [vmem:[#allocation19 + $0x6c8] sm:$0xff] }
 0x455   : > { %v3694_v60 = vcombine.high %v1171_v54, %v1175_v55  ;;  %v3693_v5 = vcombine.low %v1171_v54, %v1175_v55  ;;  %v3695_v6 = vcombine.low %v1172_v56, %v1176_v57  ;;  %v978_v54 = vld [vmem:[#allocation19 + $0xb8] sm:$0xff] }
 0x456   : > { %2899 = vmatpush1.bf16.msra.mxu1 %v3629_v61  ;;  %v3696_v61 = vcombine.high %v1172_v56, %v1176_v57  ;;  %v3491_v56 = vcombine.low %v966_v47, %v970_v48  ;;  %v3498_v57 = vcombine.high %v973_v62, %v977_v15 }
 0x457   : > { %2981 = vmatpush1.bf16.msra.mxu0 %v3631_v63  ;;  %2900 = vmatprep.subr.bf16.mxu1 %v3638_v0  ;;  %v1179_v63 = vld [vmem:[#allocation19 + $0x700] sm:$0xff] }
 0x458   : > { %2982 = vmatprep.subr.bf16.mxu0 %v3640_v2  ;;  %v1183_v0 = vld [vmem:[#allocation19 + $0x720] sm:$0xff]  ;;  %v1180_v2 = vld [vmem:[#allocation19 + $0x708] sm:$0xff] }
 0x459   : > { %v3702_v7 = vcombine.high %v1179_v63, %v1183_v0  ;;  %v3701_v14 = vcombine.low %v1179_v63, %v1183_v0  ;;  %v3703_v1 = vcombine.low %v1180_v2, %v1184_v4  ;;  %v986_v63 = vld [vmem:[#allocation19 + $0xf8] sm:$0xff]  ;;  %v3497_v0 = vcombine.low %v973_v62, %v977_v15 }
 0x45a   : > { %2901 = vmatpush1.bf16.msra.mxu1 %v3637_v8  ;;  %v3704_v8 = vcombine.high %v1180_v2, %v1184_v4 }
 0x45b   : > { %2983 = vmatpush1.bf16.msra.mxu0 %v3639_v9  ;;  %2902 = vmatprep.subr.bf16.mxu1 %v3646_v11  ;;  %v1187_v9 = vld [vmem:[#allocation19 + $0x740] sm:$0xff] }
 0x45c   : > { %2984 = vmatprep.subr.bf16.mxu0 %v3648_v12  ;;  %v1191_v11 = vld [vmem:[#allocation19 + $0x760] sm:$0xff]  ;;  %v1188_v12 = vld [vmem:[#allocation19 + $0x748] sm:$0xff] }
 0x45d   : > { %v3710_v16 = vcombine.high %v1187_v9, %v1191_v11  ;;  %v3709_v22 = vcombine.low %v1187_v9, %v1191_v11  ;;  %v3711_v23 = vcombine.low %v1188_v12, %v1192_v13  ;;  %v994_v9 = vld [vmem:[#allocation19 + $0x138] sm:$0xff] }
 0x45e   : > { %2903 = vmatpush1.bf16.msra.mxu1 %v3645_v17  ;;  %v3712_v17 = vcombine.high %v1188_v12, %v1192_v13 }
 0x45f   : > { %2985 = vmatpush1.bf16.msra.mxu0 %v3647_v18  ;;  %2904 = vmatprep.subr.bf16.mxu1 %v3654_v19  ;;  %v1195_v18 = vld [vmem:[#allocation19 + $0x780] sm:$0xff] }
 0x460   : > { %2986 = vmatprep.subr.bf16.mxu0 %v3656_v20  ;;  %v1199_v19 = vld [vmem:[#allocation19 + $0x7a0] sm:$0xff]  ;;  %v1196_v20 = vld [vmem:[#allocation19 + $0x788] sm:$0xff] }
 0x461   : > { %v3718_v24 = vcombine.high %v1195_v18, %v1199_v19  ;;  %v3717_v28 = vcombine.low %v1195_v18, %v1199_v19  ;;  %v3719_v10 = vcombine.low %v1196_v20, %v1200_v21 }
 0x462   : > { %2905 = vmatpush1.bf16.msra.mxu1 %v3653_v25  ;;  %v3720_v25 = vcombine.high %v1196_v20, %v1200_v21 }
 0x463   : > { %2987 = vmatpush1.bf16.msra.mxu0 %v3655_v29  ;;  %2906 = vmatprep.subr.bf16.mxu1 %v3662_v30  ;;  %v1203_v29 = vld [vmem:[#allocation19 + $0x7c0] sm:$0xff] }
 0x464   : > { %2988 = vmatprep.subr.bf16.mxu0 %v3664_v31  ;;  %v1207_v30 = vld [vmem:[#allocation19 + $0x7e0] sm:$0xff]  ;;  %v1204_v31 = vld [vmem:[#allocation19 + $0x7c8] sm:$0xff] }
 0x465   : > { %v3726_v33 = vcombine.high %v1203_v29, %v1207_v30  ;;  %v3725_v39 = vcombine.low %v1203_v29, %v1207_v30  ;;  %v3727_v41 = vcombine.low %v1204_v31, %v1208_v32 }
 0x466   : > { %2907 = vmatpush1.bf16.msra.mxu1 %v3661_v34  ;;  %v3728_v34 = vcombine.high %v1204_v31, %v1208_v32 }
 0x467   : > { %2989 = vmatpush1.bf16.msra.mxu0 %v3663_v35  ;;  %2908 = vmatprep.subr.bf16.mxu1 %v3670_v36  ;;  %v957_v35 = vld [vmem:[#allocation19 + $0x10] sm:$0xff] }
 0x468   : > { %2990 = vmatprep.subr.bf16.mxu0 %v3672_v37  ;;  %v961_v36 = vld [vmem:[#allocation19 + $0x30] sm:$0xff]  ;;  %v958_v37 = vld [vmem:[#allocation19 + $0x18] sm:$0xff] }
 0x469   : > { %v3481_v46 = vcombine.low %v957_v35, %v961_v36 }
 0x46a   : > { %2909 = vmatpush1.bf16.msra.mxu1 %v3669_v3  ;;  %v3482_v3 = vcombine.high %v957_v35, %v961_v36 }
 0x46b   : > { %2991 = vmatpush1.bf16.msra.mxu0 %v3671_v43  ;;  %2910 = vmatprep.subr.bf16.mxu1 %v3678_v44  ;;  %v3484_v43 = vcombine.high %v958_v37, %v962_v26  ;;  %v965_v44 = vld [vmem:[#allocation19 + $0x50] sm:$0xff] }
 0x46c   : > { %2992 = vmatprep.subr.bf16.mxu0 %v3680_v45  ;;  %v969_v45 = vld [vmem:[#allocation19 + $0x70] sm:$0xff] }
 0x46d   : > { %v3489_v55 = vcombine.low %v965_v44, %v969_v45 }
 0x46e   : > { %2911 = vmatpush1.bf16.msra.mxu1 %v3677_v50  ;;  %v3483_v50 = vcombine.low %v958_v37, %v962_v26 }
 0x46f   : > { %2993 = vmatpush1.bf16.msra.mxu0 %v3679_v51  ;;  %2912 = vmatprep.subr.bf16.mxu1 %v3686_v52  ;;  %v3490_v51 = vcombine.high %v965_v44, %v969_v45  ;;  %v3492_v52 = vcombine.high %v966_v47, %v970_v48  ;;  %v1029_v47 = vld [vmem:[#allocation19 + $0x250] sm:$0xff] }
 0x470   : > { %2994 = vmatprep.subr.bf16.mxu0 %v3688_v53  ;;  %v974_v53 = vld [vmem:[#allocation19 + $0x98] sm:$0xff]  ;;  %v1033_v48 = vld [vmem:[#allocation19 + $0x270] sm:$0xff] }
 0x471   : > { %v3499_v2 = vcombine.low %v974_v53, %v978_v54 }
 0x472   : > { %2913 = vmatpush1.bf16.msra.mxu1 %v3685_v58  ;;  %v3500_v58 = vcombine.high %v974_v53, %v978_v54  ;;  %v1037_v54 = vld [vmem:[#allocation19 + $0x290] sm:$0xff] }
 0x473   : > { %2995 = vmatpush1.bf16.msra.mxu0 %v3687_v59  ;;  %2914 = vmatprep.subr.bf16.mxu1 %v3694_v60  ;;  %v981_v59 = vld [vmem:[#allocation19 + $0xd0] sm:$0xff] }
 0x474   : > { %2996 = vmatprep.subr.bf16.mxu0 %v3696_v61  ;;  %v985_v60 = vld [vmem:[#allocation19 + $0xf0] sm:$0xff]  ;;  %v982_v61 = vld [vmem:[#allocation19 + $0xd8] sm:$0xff] }
 0x475   : > { %v3506_v4 = vcombine.high %v981_v59, %v985_v60  ;;  %v3507_v11 = vcombine.low %v982_v61, %v986_v63 }
 0x476   : > { %2915 = vmatpush1.bf16.msra.mxu1 %v3693_v5  ;;  %v3508_v5 = vcombine.high %v982_v61, %v986_v63  ;;  %v1045_v63 = vld [vmem:[#allocation19 + $0x2d0] sm:$0xff] }
 0x477   : > { %2997 = vmatpush1.bf16.msra.mxu0 %v3695_v6  ;;  %2916 = vmatprep.subr.bf16.mxu1 %v3702_v7  ;;  %v989_v6 = vld [vmem:[#allocation19 + $0x110] sm:$0xff] }
 0x478   : > { %2998 = vmatprep.subr.bf16.mxu0 %v3704_v8  ;;  %v993_v7 = vld [vmem:[#allocation19 + $0x130] sm:$0xff]  ;;  %v990_v8 = vld [vmem:[#allocation19 + $0x118] sm:$0xff] }
 0x479   : > { %v3514_v12 = vcombine.high %v989_v6, %v993_v7  ;;  %v3516_v13 = vcombine.high %v990_v8, %v994_v9  ;;  %v3513_v18 = vcombine.low %v989_v6, %v993_v7  ;;  %v3515_v19 = vcombine.low %v990_v8, %v994_v9  ;;  %v1053_v9 = vld [vmem:[#allocation19 + $0x310] sm:$0xff] }
 0x47a   : > { %2917 = vmatpush1.bf16.msra.mxu1 %v3701_v14  ;;  %v997_v14 = vld [vmem:[#allocation19 + $0x150] sm:$0xff] }
 0x47b   : > { %2999 = vmatpush1.bf16.msra.mxu0 %v3703_v1  ;;  %2918 = vmatprep.subr.bf16.mxu1 %v3710_v16  ;;  %v1001_v1 = vld [vmem:[#allocation19 + $0x170] sm:$0xff]  ;;  %v998_v16 = vld [vmem:[#allocation19 + $0x158] sm:$0xff] }
 0x47c   : > { %3000 = vmatprep.subr.bf16.mxu0 %v3712_v17  ;;  %v1002_v17 = vld [vmem:[#allocation19 + $0x178] sm:$0xff]  ;;  %v3522_v20 = vcombine.high %v997_v14, %v1001_v1  ;;  %v3521_v29 = vcombine.low %v997_v14, %v1001_v1 }
 0x47d   : > { %v3524_v21 = vcombine.high %v998_v16, %v1002_v17  ;;  %v3523_v30 = vcombine.low %v998_v16, %v1002_v17  ;;  %v1061_v17 = vld [vmem:[#allocation19 + $0x350] sm:$0xff] }
 0x47e   : > { %2919 = vmatpush1.bf16.msra.mxu1 %v3709_v22  ;;  %v1005_v22 = vld [vmem:[#allocation19 + $0x190] sm:$0xff] }
 0x47f   : > { %3001 = vmatpush1.bf16.msra.mxu0 %v3711_v23  ;;  %2920 = vmatprep.subr.bf16.mxu1 %v3718_v24  ;;  %v1009_v23 = vld [vmem:[#allocation19 + $0x1b0] sm:$0xff]  ;;  %v1006_v24 = vld [vmem:[#allocation19 + $0x198] sm:$0xff] }
 0x480   : > { %3002 = vmatprep.subr.bf16.mxu0 %v3720_v25  ;;  %v1010_v25 = vld [vmem:[#allocation19 + $0x1b8] sm:$0xff]  ;;  %v3530_v31 = vcombine.high %v1005_v22, %v1009_v23  ;;  %v3529_v35 = vcombine.low %v1005_v22, %v1009_v23 }
 0x481   : > { %v3532_v32 = vcombine.high %v1006_v24, %v1010_v25  ;;  %v3531_v36 = vcombine.low %v1006_v24, %v1010_v25  ;;  %v1069_v25 = vld [vmem:[#allocation19 + $0x390] sm:$0xff] }
 0x482   : > { %2921 = vmatpush1.bf16.msra.mxu1 %v3717_v28  ;;  %v1013_v28 = vld [vmem:[#allocation19 + $0x1d0] sm:$0xff] }
 0x483   : > { %3003 = vmatpush1.bf16.msra.mxu0 %v3719_v10  ;;  %2922 = vmatprep.subr.bf16.mxu1 %v3726_v33  ;;  %v1017_v10 = vld [vmem:[#allocation19 + $0x1f0] sm:$0xff]  ;;  %v1014_v33 = vld [vmem:[#allocation19 + $0x1d8] sm:$0xff] }
 0x484   : > { %3004 = vmatprep.subr.bf16.mxu0 %v3728_v34  ;;  %v1018_v34 = vld [vmem:[#allocation19 + $0x1f8] sm:$0xff]  ;;  %v3538_v37 = vcombine.high %v1013_v28, %v1017_v10 }
 0x485   : > { %v3540_v26 = vcombine.high %v1014_v33, %v1018_v34  ;;  %v3539_v44 = vcombine.low %v1014_v33, %v1018_v34  ;;  %v1077_v34 = vld [vmem:[#allocation19 + $0x3d0] sm:$0xff] }
 0x486   : > { %2923 = vmatpush1.bf16.msra.mxu1 %v3725_v39  ;;  %v1021_v39 = vld [vmem:[#allocation19 + $0x210] sm:$0xff] }
 0x487   : > { %3005 = vmatpush1.bf16.msra.mxu0 %v3727_v41  ;;  %3015 = vmatprep.subr.bf16.mxu1 %v3482_v3  ;;  %v1022_v41 = vld [vmem:[#allocation19 + $0x218] sm:$0xff]  ;;  %v3546_v45 = vcombine.high %v1021_v39, %v1025_v40  ;;  %v3545_v62 = vcombine.low %v1021_v39, %v1025_v40 }
 0x488   : > { %3097 = vmatprep.subr.bf16.mxu0 %v3484_v43  ;;  %v1026_v3 = vld [vmem:[#allocation19 + $0x238] sm:$0xff]  ;;  %v3537_v43 = vcombine.low %v1013_v28, %v1017_v10 }
 0x489   : > { %2925 = vmatmul.mubr.bf16.vlgmr.msra.gmra.mrb[8].mxu1 %v4986_v49  ;;  %v3547_v15 = vcombine.low %v1022_v41, %v1026_v3 }
 0x48a   : > { %3007 = vmatmul.mubr.bf16.vlgmr.msra.gmra.mrb[12].mxu0 %v4986_v49  ;;  %3016 = vmatpush1.bf16.msra.mxu1 %v3481_v46  ;;  %v3548_v46 = vcombine.high %v1022_v41, %v1026_v3  ;;  %v1085_v3 = vld [vmem:[#allocation19 + $0x410] sm:$0xff] }
 0x48b   : > { %3047 = vmatprep.mubr.bf16.mxu1 %v4964_v27  ;;  %3098 = vmatpush1.bf16.msra.mxu0 %v3483_v50  ;;  %v1030_v50 = vld [vmem:[#allocation19 + $0x258] sm:$0xff] }
 0x48c   : > { %3129 = vmatprep.mubr.bf16.mxu0 %v4964_v27  ;;  %3017 = vmatprep.subr.bf16.mxu1 %v3490_v51  ;;  %v3505_v27 = vcombine.low %v981_v59, %v985_v60  ;;  %v1034_v51 = vld [vmem:[#allocation19 + $0x278] sm:$0xff] }
 0x48d   : > { %3099 = vmatprep.subr.bf16.mxu0 %v3492_v52  ;;  %v3554_v52 = vcombine.high %v1029_v47, %v1033_v48  ;;  %v3556_v53 = vcombine.high %v1030_v50, %v1034_v51  ;;  %v3555_v59 = vcombine.low %v1030_v50, %v1034_v51  ;;  %v1093_v51 = vld [vmem:[#allocation19 + $0x450] sm:$0xff] }
 0x48e   : > { %3018 = vmatpush1.bf16.msra.mxu1 %v3489_v55  ;;  %v1041_v55 = vld [vmem:[#allocation19 + $0x2b0] sm:$0xff] }
 0x48f   : > { %3100 = vmatpush1.bf16.msra.mxu0 %v3491_v56  ;;  %3019 = vmatprep.subr.bf16.mxu1 %v3498_v57  ;;  %v1038_v56 = vld [vmem:[#allocation19 + $0x298] sm:$0xff]  ;;  %v3562_v60 = vcombine.high %v1037_v54, %v1041_v55 }
 0x490   : > { %3101 = vmatprep.subr.bf16.mxu0 %v3500_v58  ;;  %v1042_v57 = vld [vmem:[#allocation19 + $0x2b8] sm:$0xff]  ;;  %v3553_v58 = vcombine.low %v1029_v47, %v1033_v48 }
 0x491   : > { %v3564_v61 = vcombine.high %v1038_v56, %v1042_v57  ;;  %v3563_v6 = vcombine.low %v1038_v56, %v1042_v57  ;;  %v1101_v56 = vld [vmem:[#allocation19 + $0x490] sm:$0xff] }
 0x492   : > { %3020 = vmatpush1.bf16.msra.mxu1 %v3497_v0  ;;  %v1049_v0 = vld [vmem:[#allocation19 + $0x2f0] sm:$0xff] }
 0x493   : > { %3102 = vmatpush1.bf16.msra.mxu0 %v3499_v2  ;;  %3021 = vmatprep.subr.bf16.mxu1 %v3506_v4  ;;  %v1046_v2 = vld [vmem:[#allocation19 + $0x2d8] sm:$0xff]  ;;  %v3570_v7 = vcombine.high %v1045_v63, %v1049_v0  ;;  %v1105_v57 = vld [vmem:[#allocation19 + $0x4b0] sm:$0xff] }
 0x494   : > { %3103 = vmatprep.subr.bf16.mxu0 %v3508_v5  ;;  %v1050_v4 = vld [vmem:[#allocation19 + $0x2f8] sm:$0xff]  ;;  %v3561_v5 = vcombine.low %v1037_v54, %v1041_v55 }
 0x495   : > { %v3572_v8 = vcombine.high %v1046_v2, %v1050_v4  ;;  %v3571_v14 = vcombine.low %v1046_v2, %v1050_v4  ;;  %v1109_v4 = vld [vmem:[#allocation19 + $0x4d0] sm:$0xff] }
 0x496   : > { %3022 = vmatpush1.bf16.msra.mxu1 %v3505_v27  ;;  %v1057_v27 = vld [vmem:[#allocation19 + $0x330] sm:$0xff] }
 0x497   : > { %3104 = vmatpush1.bf16.msra.mxu0 %v3507_v11  ;;  %3023 = vmatprep.subr.bf16.mxu1 %v3514_v12  ;;  %v1054_v11 = vld [vmem:[#allocation19 + $0x318] sm:$0xff]  ;;  %v3578_v1 = vcombine.high %v1053_v9, %v1057_v27 }
 0x498   : > { %3105 = vmatprep.subr.bf16.mxu0 %v3516_v13  ;;  %v1058_v12 = vld [vmem:[#allocation19 + $0x338] sm:$0xff]  ;;  %v3569_v13 = vcombine.low %v1045_v63, %v1049_v0  ;;  %v3626_v0 = vcombine.high %v1101_v56, %v1105_v57 }
 0x499   : > { %v3580_v16 = vcombine.high %v1054_v11, %v1058_v12  ;;  %v3579_v22 = vcombine.low %v1054_v11, %v1058_v12  ;;  %v1117_v11 = vld [vmem:[#allocation19 + $0x510] sm:$0xff] }
 0x49a   : > { %3024 = vmatpush1.bf16.msra.mxu1 %v3513_v18  ;;  %v1065_v18 = vld [vmem:[#allocation19 + $0x370] sm:$0xff] }
 0x49b   : > { %3106 = vmatpush1.bf16.msra.mxu0 %v3515_v19  ;;  %3025 = vmatprep.subr.bf16.mxu1 %v3522_v20  ;;  %v1062_v19 = vld [vmem:[#allocation19 + $0x358] sm:$0xff]  ;;  %v3586_v23 = vcombine.high %v1061_v17, %v1065_v18  ;;  %v1121_v12 = vld [vmem:[#allocation19 + $0x530] sm:$0xff] }
 0x49c   : > { %3107 = vmatprep.subr.bf16.mxu0 %v3524_v21  ;;  %v1066_v20 = vld [vmem:[#allocation19 + $0x378] sm:$0xff]  ;;  %v3577_v21 = vcombine.low %v1053_v9, %v1057_v27 }
 0x49d   : > { %v3588_v24 = vcombine.high %v1062_v19, %v1066_v20  ;;  %v3587_v28 = vcombine.low %v1062_v19, %v1066_v20  ;;  %v1129_v19 = vld [vmem:[#allocation19 + $0x570] sm:$0xff]  ;;  %v1126_v20 = vld [vmem:[#allocation19 + $0x558] sm:$0xff] }
 0x49e   : > { %3026 = vmatpush1.bf16.msra.mxu1 %v3521_v29  ;;  %v1073_v29 = vld [vmem:[#allocation19 + $0x3b0] sm:$0xff] }
 0x49f   : > { %3108 = vmatpush1.bf16.msra.mxu0 %v3523_v30  ;;  %3027 = vmatprep.subr.bf16.mxu1 %v3530_v31  ;;  %v1070_v30 = vld [vmem:[#allocation19 + $0x398] sm:$0xff]  ;;  %v3594_v10 = vcombine.high %v1069_v25, %v1073_v29 }
 0x4a0   : > { %3109 = vmatprep.subr.bf16.mxu0 %v3532_v32  ;;  %v1074_v31 = vld [vmem:[#allocation19 + $0x3b8] sm:$0xff]  ;;  %v3585_v32 = vcombine.low %v1061_v17, %v1065_v18  ;;  %v1125_v18 = vld [vmem:[#allocation19 + $0x550] sm:$0xff] }
 0x4a1   : > { %v3596_v33 = vcombine.high %v1070_v30, %v1074_v31  ;;  %v3595_v39 = vcombine.low %v1070_v30, %v1074_v31  ;;  %v1137_v30 = vld [vmem:[#allocation19 + $0x5b0] sm:$0xff]  ;;  %v1134_v31 = vld [vmem:[#allocation19 + $0x598] sm:$0xff] }
 0x4a2   : > { %3028 = vmatpush1.bf16.msra.mxu1 %v3529_v35  ;;  %v1081_v35 = vld [vmem:[#allocation19 + $0x3f0] sm:$0xff] }
 0x4a3   : > { %3110 = vmatpush1.bf16.msra.mxu0 %v3531_v36  ;;  %3029 = vmatprep.subr.bf16.mxu1 %v3538_v37  ;;  %v1078_v36 = vld [vmem:[#allocation19 + $0x3d8] sm:$0xff]  ;;  %v3602_v40 = vcombine.high %v1077_v34, %v1081_v35 }
 0x4a4   : > { %3111 = vmatprep.subr.bf16.mxu0 %v3540_v26  ;;  %v1082_v37 = vld [vmem:[#allocation19 + $0x3f8] sm:$0xff]  ;;  %v3593_v26 = vcombine.low %v1069_v25, %v1073_v29  ;;  %v1133_v29 = vld [vmem:[#allocation19 + $0x590] sm:$0xff] }
 0x4a5   : > { %v3604_v41 = vcombine.high %v1078_v36, %v1082_v37  ;;  %v3603_v47 = vcombine.low %v1078_v36, %v1082_v37  ;;  %v1145_v36 = vld [vmem:[#allocation19 + $0x5f0] sm:$0xff]  ;;  %v1142_v37 = vld [vmem:[#allocation19 + $0x5d8] sm:$0xff] }
 0x4a6   : > { %3030 = vmatpush1.bf16.msra.mxu1 %v3537_v43  ;;  %v1089_v43 = vld [vmem:[#allocation19 + $0x430] sm:$0xff] }
 0x4a7   : > { %3112 = vmatpush1.bf16.msra.mxu0 %v3539_v44  ;;  %3031 = vmatprep.subr.bf16.mxu1 %v3546_v45  ;;  %v1086_v44 = vld [vmem:[#allocation19 + $0x418] sm:$0xff]  ;;  %v3610_v48 = vcombine.high %v1085_v3, %v1089_v43 }
 0x4a8   : > { %3113 = vmatprep.subr.bf16.mxu0 %v3548_v46  ;;  %v1090_v45 = vld [vmem:[#allocation19 + $0x438] sm:$0xff]  ;;  %v3601_v46 = vcombine.low %v1077_v34, %v1081_v35  ;;  %v1141_v35 = vld [vmem:[#allocation19 + $0x5d0] sm:$0xff] }
 0x4a9   : > { %v3612_v50 = vcombine.high %v1086_v44, %v1090_v45  ;;  %v3611_v54 = vcombine.low %v1086_v44, %v1090_v45  ;;  %v1153_v44 = vld [vmem:[#allocation19 + $0x630] sm:$0xff]  ;;  %v1150_v45 = vld [vmem:[#allocation19 + $0x618] sm:$0xff] }
 0x4aa   : > { %3032 = vmatpush1.bf16.msra.mxu1 %v3545_v62  ;;  %v1097_v62 = vld [vmem:[#allocation19 + $0x470] sm:$0xff] }
 0x4ab   : > { %3114 = vmatpush1.bf16.msra.mxu0 %v3547_v15  ;;  %3033 = vmatprep.subr.bf16.mxu1 %v3554_v52  ;;  %v3609_v15 = vcombine.low %v1085_v3, %v1089_v43  ;;  %v1094_v52 = vld [vmem:[#allocation19 + $0x458] sm:$0xff]  ;;  %v3618_v55 = vcombine.high %v1093_v51, %v1097_v62  ;;  %v1149_v43 = vld [vmem:[#allocation19 + $0x610] sm:$0xff] }
 0x4ac   : > { %3115 = vmatprep.subr.bf16.mxu0 %v3556_v53  ;;  %v1098_v53 = vld [vmem:[#allocation19 + $0x478] sm:$0xff] }
 0x4ad   : > { %v3619_v63 = vcombine.low %v1094_v52, %v1098_v53 }
 0x4ae   : > { %3034 = vmatpush1.bf16.msra.mxu1 %v3553_v58  ;;  %v3620_v58 = vcombine.high %v1094_v52, %v1098_v53  ;;  %v1158_v52 = vld [vmem:[#allocation19 + $0x658] sm:$0xff] }
 0x4af   : > { %3116 = vmatpush1.bf16.msra.mxu0 %v3555_v59  ;;  %3035 = vmatprep.subr.bf16.mxu1 %v3562_v60  ;;  %v1102_v59 = vld [vmem:[#allocation19 + $0x498] sm:$0xff] }
 0x4b0   : > { %3117 = vmatprep.subr.bf16.mxu0 %v3564_v61  ;;  %v1106_v60 = vld [vmem:[#allocation19 + $0x4b8] sm:$0xff]  ;;  %v3617_v61 = vcombine.low %v1093_v51, %v1097_v62  ;;  %v1157_v62 = vld [vmem:[#allocation19 + $0x650] sm:$0xff] }
 0x4b1   : > { %v3628_v2 = vcombine.high %v1102_v59, %v1106_v60  ;;  %v1162_v53 = vld [vmem:[#allocation19 + $0x678] sm:$0xff] }
 0x4b2   : > { %3036 = vmatpush1.bf16.msra.mxu1 %v3561_v5  ;;  %v1113_v5 = vld [vmem:[#allocation19 + $0x4f0] sm:$0xff] }
 0x4b3   : > { %3118 = vmatpush1.bf16.msra.mxu0 %v3563_v6  ;;  %3037 = vmatprep.subr.bf16.mxu1 %v3570_v7  ;;  %v1110_v6 = vld [vmem:[#allocation19 + $0x4d8] sm:$0xff]  ;;  %v3634_v9 = vcombine.high %v1109_v4, %v1113_v5 }
 0x4b4   : > { %3119 = vmatprep.subr.bf16.mxu0 %v3572_v8  ;;  %v1114_v7 = vld [vmem:[#allocation19 + $0x4f8] sm:$0xff]  ;;  %v3625_v8 = vcombine.low %v1101_v56, %v1105_v57  ;;  %v3684_v57 = vcombine.high %v1158_v52, %v1162_v53 }
 0x4b5   : > { %v3636_v27 = vcombine.high %v1110_v6, %v1114_v7 }
 0x4b6   : > { %3038 = vmatpush1.bf16.msra.mxu1 %v3569_v13  ;;  %v1118_v13 = vld [vmem:[#allocation19 + $0x518] sm:$0xff] }
 0x4b7   : > { %3120 = vmatpush1.bf16.msra.mxu0 %v3571_v14  ;;  %3039 = vmatprep.subr.bf16.mxu1 %v3578_v1  ;;  %v1122_v14 = vld [vmem:[#allocation19 + $0x538] sm:$0xff]  ;;  %v3635_v1 = vcombine.low %v1110_v6, %v1114_v7  ;;  %v1177_v6 = vld [vmem:[#allocation19 + $0x6f0] sm:$0xff] }
 0x4b8   : > { %3121 = vmatprep.subr.bf16.mxu0 %v3580_v16  ;;  %v3642_v16 = vcombine.high %v1117_v11, %v1121_v12  ;;  %v3644_v17 = vcombine.high %v1118_v13, %v1122_v14  ;;  %v1174_v7 = vld [vmem:[#allocation19 + $0x6d8] sm:$0xff] }
 0x4ba   : > { %3040 = vmatpush1.bf16.msra.mxu1 %v3577_v21  ;;  %v1130_v21 = vld [vmem:[#allocation19 + $0x578] sm:$0xff] }
 0x4bb   : > { %3122 = vmatpush1.bf16.msra.mxu0 %v3579_v22  ;;  %3041 = vmatprep.subr.bf16.mxu1 %v3586_v23  ;;  %v3641_v22 = vcombine.low %v1117_v11, %v1121_v12  ;;  %v3643_v23 = vcombine.low %v1118_v13, %v1122_v14  ;;  %v3652_v25 = vcombine.high %v1126_v20, %v1130_v21  ;;  %v1181_v12 = vld [vmem:[#allocation19 + $0x710] sm:$0xff]  ;;  %v1182_v14 = vld [vmem:[#allocation19 + $0x718] sm:$0xff] }
 0x4bc   : > { %3123 = vmatprep.subr.bf16.mxu0 %v3588_v24  ;;  %v3650_v24 = vcombine.high %v1125_v18, %v1129_v19  ;;  %v1185_v13 = vld [vmem:[#allocation19 + $0x730] sm:$0xff] }
 0x4be   : > { %3042 = vmatpush1.bf16.msra.mxu1 %v3585_v32  ;;  %v1138_v32 = vld [vmem:[#allocation19 + $0x5b8] sm:$0xff] }
 0x4bf   : > { %3124 = vmatpush1.bf16.msra.mxu0 %v3587_v28  ;;  %3043 = vmatprep.subr.bf16.mxu1 %v3594_v10  ;;  %v3649_v28 = vcombine.low %v1125_v18, %v1129_v19  ;;  %v3651_v10 = vcombine.low %v1126_v20, %v1130_v21  ;;  %v3660_v34 = vcombine.high %v1134_v31, %v1138_v32  ;;  %v1189_v19 = vld [vmem:[#allocation19 + $0x750] sm:$0xff]  ;;  %v1190_v21 = vld [vmem:[#allocation19 + $0x758] sm:$0xff] }
 0x4c0   : > { %3125 = vmatprep.subr.bf16.mxu0 %v3596_v33  ;;  %v3658_v33 = vcombine.high %v1133_v29, %v1137_v30  ;;  %v1193_v20 = vld [vmem:[#allocation19 + $0x770] sm:$0xff] }
 0x4c2   : > { %3044 = vmatpush1.bf16.msra.mxu1 %v3593_v26  ;;  %v1146_v26 = vld [vmem:[#allocation19 + $0x5f8] sm:$0xff] }
 0x4c3   : > { %3126 = vmatpush1.bf16.msra.mxu0 %v3595_v39  ;;  %3045 = vmatprep.subr.bf16.mxu1 %v3602_v40  ;;  %v3657_v39 = vcombine.low %v1133_v29, %v1137_v30  ;;  %v3659_v40 = vcombine.low %v1134_v31, %v1138_v32  ;;  %v3668_v3 = vcombine.high %v1142_v37, %v1146_v26  ;;  %v1197_v30 = vld [vmem:[#allocation19 + $0x790] sm:$0xff]  ;;  %v1198_v32 = vld [vmem:[#allocation19 + $0x798] sm:$0xff] }
 0x4c4   : > { %3127 = vmatprep.subr.bf16.mxu0 %v3604_v41  ;;  %v3666_v41 = vcombine.high %v1141_v35, %v1145_v36  ;;  %v1201_v31 = vld [vmem:[#allocation19 + $0x7b0] sm:$0xff] }
 0x4c6   : > { %3046 = vmatpush1.bf16.msra.mxu1 %v3601_v46  ;;  %v1154_v46 = vld [vmem:[#allocation19 + $0x638] sm:$0xff] }
 0x4c7   : > { %3128 = vmatpush1.bf16.msra.mxu0 %v3603_v47  ;;  %3056 = vmatprep.subr.bf16.mxu1 %v3610_v48  ;;  %v3665_v47 = vcombine.low %v1141_v35, %v1145_v36  ;;  %v3667_v48 = vcombine.low %v1142_v37, %v1146_v26  ;;  %v3676_v51 = vcombine.high %v1150_v45, %v1154_v46  ;;  %v1205_v36 = vld [vmem:[#allocation19 + $0x7d0] sm:$0xff]  ;;  %v1206_v26 = vld [vmem:[#allocation19 + $0x7d8] sm:$0xff] }
 0x4c8   : > { %3138 = vmatprep.subr.bf16.mxu0 %v3612_v50  ;;  %v3674_v50 = vcombine.high %v1149_v43, %v1153_v44  ;;  %v1209_v37 = vld [vmem:[#allocation19 + $0x7f0] sm:$0xff] }
 0x4c9   : > { %3048 = vmatmul.mubr.bf16.vlgmr.msra.gmra.mrb[12].mxu1 %v4976_v38 }
 0x4ca   : > { %3130 = vmatmul.mubr.bf16.vlgmr.msra.gmra.mrb[16].mxu0 %v4976_v38  ;;  %3057 = vmatpush1.bf16.msra.mxu1 %v3609_v15  ;;  %v3627_v38 = vcombine.low %v1102_v59, %v1106_v60  ;;  %v1161_v15 = vld [vmem:[#allocation19 + $0x670] sm:$0xff]  ;;  %v1166_v60 = vld [vmem:[#allocation19 + $0x698] sm:$0xff] }
 0x4cb   : > { %3088 = vmatprep.mubr.bf16.mxu1 %v4978_v42  ;;  %3139 = vmatpush1.bf16.msra.mxu0 %v3611_v54  ;;  %v3673_v54 = vcombine.low %v1149_v43, %v1153_v44  ;;  %v3682_v56 = vcombine.high %v1157_v62, %v1161_v15  ;;  %v1169_v59 = vld [vmem:[#allocation19 + $0x6b0] sm:$0xff]  ;;  %v3729_v44 = vcombine.low %v1205_v36, %v1209_v37 }
 0x4cc   : > { %3170 = vmatprep.mubr.bf16.mxu0 %v4978_v42  ;;  %3058 = vmatprep.subr.bf16.mxu1 %v3618_v55  ;;  %v3633_v42 = vcombine.low %v1109_v4, %v1113_v5  ;;  %v3675_v55 = vcombine.low %v1150_v45, %v1154_v46  ;;  %v1173_v5 = vld [vmem:[#allocation19 + $0x6d0] sm:$0xff] }
 0x4cd   : > { %3140 = vmatprep.subr.bf16.mxu0 %v3620_v58  ;;  %v1165_v58 = vld [vmem:[#allocation19 + $0x690] sm:$0xff] }
 0x4ce   : > { %3059 = vmatpush1.bf16.msra.mxu1 %v3617_v61  ;;  %v1170_v61 = vld [vmem:[#allocation19 + $0x6b8] sm:$0xff] }
 0x4cf   : > { %3141 = vmatpush1.bf16.msra.mxu0 %v3619_v63  ;;  %3060 = vmatprep.subr.bf16.mxu1 %v3626_v0  ;;  %v3681_v63 = vcombine.low %v1157_v62, %v1161_v15  ;;  %v3683_v0 = vcombine.low %v1158_v52, %v1162_v53  ;;  %v3692_v4 = vcombine.high %v1166_v60, %v1170_v61 }
 0x4d0   : > { %3142 = vmatprep.subr.bf16.mxu0 %v3628_v2  ;;  %v3690_v2 = vcombine.high %v1165_v58, %v1169_v59 }
 0x4d2   : > { %3061 = vmatpush1.bf16.msra.mxu1 %v3625_v8  ;;  %v1178_v8 = vld [vmem:[#allocation19 + $0x6f8] sm:$0xff] }
 0x4d3   : > { %3143 = vmatpush1.bf16.msra.mxu0 %v3627_v38  ;;  %3062 = vmatprep.subr.bf16.mxu1 %v3634_v9  ;;  %v3689_v38 = vcombine.low %v1165_v58, %v1169_v59  ;;  %v3691_v9 = vcombine.low %v1166_v60, %v1170_v61  ;;  %v3700_v11 = vcombine.high %v1174_v7, %v1178_v8 }
 0x4d4   : > { %3144 = vmatprep.subr.bf16.mxu0 %v3636_v27  ;;  %v3698_v27 = vcombine.high %v1173_v5, %v1177_v6 }
 0x4d6   : > { %3063 = vmatpush1.bf16.msra.mxu1 %v3633_v42  ;;  %v1186_v42 = vld [vmem:[#allocation19 + $0x738] sm:$0xff] }
 0x4d7   : > { %3145 = vmatpush1.bf16.msra.mxu0 %v3635_v1  ;;  %3064 = vmatprep.subr.bf16.mxu1 %v3642_v16  ;;  %v3697_v1 = vcombine.low %v1173_v5, %v1177_v6  ;;  %v3699_v16 = vcombine.low %v1174_v7, %v1178_v8  ;;  %v3708_v18 = vcombine.high %v1182_v14, %v1186_v42 }
 0x4d8   : > { %3146 = vmatprep.subr.bf16.mxu0 %v3644_v17  ;;  %v3706_v17 = vcombine.high %v1181_v12, %v1185_v13 }
 0x4da   : > { %3065 = vmatpush1.bf16.msra.mxu1 %v3641_v22  ;;  %v1194_v22 = vld [vmem:[#allocation19 + $0x778] sm:$0xff] }
 0x4db   : > { %3147 = vmatpush1.bf16.msra.mxu0 %v3643_v23  ;;  %3066 = vmatprep.subr.bf16.mxu1 %v3650_v24  ;;  %v3705_v23 = vcombine.low %v1181_v12, %v1185_v13  ;;  %v3707_v24 = vcombine.low %v1182_v14, %v1186_v42  ;;  %v3716_v29 = vcombine.high %v1190_v21, %v1194_v22 }
 0x4dc   : > { %3148 = vmatprep.subr.bf16.mxu0 %v3652_v25  ;;  %v3714_v25 = vcombine.high %v1189_v19, %v1193_v20 }
 0x4de   : > { %3067 = vmatpush1.bf16.msra.mxu1 %v3649_v28  ;;  %v1202_v28 = vld [vmem:[#allocation19 + $0x7b8] sm:$0xff] }
 0x4df   : > { %3149 = vmatpush1.bf16.msra.mxu0 %v3651_v10  ;;  %3068 = vmatprep.subr.bf16.mxu1 %v3658_v33  ;;  %v3713_v10 = vcombine.low %v1189_v19, %v1193_v20  ;;  %v3715_v33 = vcombine.low %v1190_v21, %v1194_v22  ;;  %v3724_v35 = vcombine.high %v1198_v32, %v1202_v28 }
 0x4e0   : > { %3150 = vmatprep.subr.bf16.mxu0 %v3660_v34  ;;  %v3722_v34 = vcombine.high %v1197_v30, %v1201_v31 }
 0x4e2   : > { %3069 = vmatpush1.bf16.msra.mxu1 %v3657_v39  ;;  %v1210_v39 = vld [vmem:[#allocation19 + $0x7f8] sm:$0xff] }
 0x4e3   : > { %3151 = vmatpush1.bf16.msra.mxu0 %v3659_v40  ;;  %3070 = vmatprep.subr.bf16.mxu1 %v3666_v41  ;;  %v3721_v40 = vcombine.low %v1197_v30, %v1201_v31  ;;  %v3723_v41 = vcombine.low %v1198_v32, %v1202_v28  ;;  %v3732_v43 = vcombine.high %v1206_v26, %v1210_v39 }
 0x4e4   : > { %3152 = vmatprep.subr.bf16.mxu0 %v3668_v3  ;;  %v3730_v3 = vcombine.high %v1205_v36, %v1209_v37  ;;  %v3731_v45 = vcombine.low %v1206_v26, %v1210_v39 }
 0x4e6   : > { %3071 = vmatpush1.bf16.msra.mxu1 %v3665_v47 }
 0x4e7   : > { %3153 = vmatpush1.bf16.msra.mxu0 %v3667_v48  ;;  %3072 = vmatprep.subr.bf16.mxu1 %v3674_v50 }
 0x4e8   : > { %3154 = vmatprep.subr.bf16.mxu0 %v3676_v51 }
 0x4ea   : > { %3073 = vmatpush1.bf16.msra.mxu1 %v3673_v54 }
 0x4eb   : > { %3155 = vmatpush1.bf16.msra.mxu0 %v3675_v55  ;;  %3074 = vmatprep.subr.bf16.mxu1 %v3682_v56 }
 0x4ec   : > { %3156 = vmatprep.subr.bf16.mxu0 %v3684_v57 }
 0x4ee   : > { %3075 = vmatpush1.bf16.msra.mxu1 %v3681_v63 }
 0x4ef   : > { %3157 = vmatpush1.bf16.msra.mxu0 %v3683_v0  ;;  %3076 = vmatprep.subr.bf16.mxu1 %v3690_v2 }
 0x4f0   : > { %3158 = vmatprep.subr.bf16.mxu0 %v3692_v4 }
 0x4f2   : > { %3077 = vmatpush1.bf16.msra.mxu1 %v3689_v38 }
 0x4f3   : > { %3159 = vmatpush1.bf16.msra.mxu0 %v3691_v9  ;;  %3078 = vmatprep.subr.bf16.mxu1 %v3698_v27 }
 0x4f4   : > { %3160 = vmatprep.subr.bf16.mxu0 %v3700_v11 }
 0x4f6   : > { %3079 = vmatpush1.bf16.msra.mxu1 %v3697_v1 }
 0x4f7   : > { %3161 = vmatpush1.bf16.msra.mxu0 %v3699_v16  ;;  %3080 = vmatprep.subr.bf16.mxu1 %v3706_v17 }
 0x4f8   : > { %3162 = vmatprep.subr.bf16.mxu0 %v3708_v18 }
 0x4fa   : > { %3081 = vmatpush1.bf16.msra.mxu1 %v3705_v23 }
 0x4fb   : > { %3163 = vmatpush1.bf16.msra.mxu0 %v3707_v24  ;;  %3082 = vmatprep.subr.bf16.mxu1 %v3714_v25 }
 0x4fc   : > { %3164 = vmatprep.subr.bf16.mxu0 %v3716_v29 }
 0x4fe   : > { %3083 = vmatpush1.bf16.msra.mxu1 %v3713_v10 }
 0x4ff   : > { %3165 = vmatpush1.bf16.msra.mxu0 %v3715_v33  ;;  %3084 = vmatprep.subr.bf16.mxu1 %v3722_v34 }
 0x500   : > { %3166 = vmatprep.subr.bf16.mxu0 %v3724_v35 }
 0x502   : > { %3085 = vmatpush1.bf16.msra.mxu1 %v3721_v40 }
 0x503   : > { %3167 = vmatpush1.bf16.msra.mxu0 %v3723_v41  ;;  %3086 = vmatprep.subr.bf16.mxu1 %v3730_v3 }
 0x504   : > { %3168 = vmatprep.subr.bf16.mxu0 %v3732_v43 }
 0x506   : > { %3087 = vmatpush1.bf16.msra.mxu1 %v3729_v44 }
 0x507   : > { %3169 = vmatpush1.bf16.msra.mxu0 %v3731_v45 }
 0x509   : > { %3089 = vmatmul.mubr.bf16.vlgmr.msra.gmra.mrb[12].mxu1 %v4986_v49 }
 0x50a   : > { %3171 = vmatmul.mubr.bf16.vlgmr.msra.gmra.mrb[16].mxu0 %v4986_v49 }
 0x55c   : > { %v2926_v46 = vpop.f32.mrb[8].mxu1 }
 0x55d   : > { %3179 = vst [vmem:[%s606_s25] sm:$0x1f] %v2926_v46  ;;  %v3008_v47 = vpop.f32.mrb[12].mxu0  ;;  %v2928_v48 = vpop.f32.mrb[9].mxu1 }
 0x55e   : > { %3181 = vst [vmem:[%s606_s25 + $0x10] sm:$0x1f] %v3008_v47  ;;  %3180 = vst [vmem:[%s606_s25 + $0x8] sm:$0x1f] %v2928_v48  ;;  %v3010_v50 = vpop.f32.mrb[13].mxu0  ;;  %v2930_v51 = vpop.f32.mrb[10].mxu1 }
 0x55f   : > { %3182 = vst [vmem:[%s606_s25 + $0x18] sm:$0x1f] %v3010_v50  ;;  %v3012_v62 = vpop.f32.mrb[14].mxu0  ;;  %v2931_v15 = vpop.f32.mrb[11].mxu1 }
 0x560   : > { %v3013_v52 = vpop.f32.mrb[15].mxu0 }
 0x5dc   : > { %v3090_v53 = vpop.f32.mrb[12].mxu1 }
 0x5dd   : > { %3183 = vst [vmem:[%s606_s25 + $0x20] sm:$0x1f] %v3090_v53  ;;  %v3172_v49 = vpop.f32.mrb[16].mxu0  ;;  %v3092_v54 = vpop.f32.mrb[13].mxu1 }
 0x5de   : > { %3185 = vst [vmem:[%s606_s25 + $0x30] sm:$0x1f] %v3172_v49  ;;  %3184 = vst [vmem:[%s606_s25 + $0x28] sm:$0x1f] %v3092_v54  ;;  %v3174_v55 = vpop.f32.mrb[17].mxu0  ;;  %v3094_v56 = vpop.f32.mrb[14].mxu1 }
 0x5df   : > { %3187 = vst.msk [vmem:[%s606_s25 + $0x38] sm:$0x1f] %vm3186_vm6, %v3174_v55  ;;  %v3176_v57 = vpop.f32.mrb[18].mxu0  ;;  %v3095_v58 = vpop.f32.mrb[15].mxu1 }
 0x5e0   : > { %v3177_v59 = vpop.f32.mrb[19].mxu0 }
 0x5e1   : > { %4335 = shalt.err (!%p4332_p11)
}
 0x5e2   : > { %s4336_s16 = scalar_lea.hbm %s5003_s0, 1024  ;;  %s4340_s7 = scalar_lea.hbm %s5124_s14, 2048 }
 0x5e3   : > { %p4337_p12 = scmp.ne.s32.totalorder %s5003_s0, %s4336_s16  ;;  %p4341_p9 = scmp.lt.u32.totalorder %s5003_s0, %s5124_s14 }
 0x5e4   : > { %p4342_p0 = scmp.lt.u32.totalorder %s4340_s7, %s4336_s16  ;;  %p4344_p3 = scmp.lt.u32.totalorder %s4336_s16, %s5003_s0 }
 0x5e5   : > { %p4338_p6 = pnand %p4337_p12, %p5125_p13 }
 0x5e6   : > { %p4343_p2 = por %p4342_p0, %p4341_p9 }
 0x5e7   : > { %p4339_p7 = pneg %p4338_p6 }
 0x5e8   : > { %p4345_p4 = por %p4344_p3, %p4343_p2 }
 0x5ea   : > { %p4346_p8 = pnand %p4345_p4, %p4339_p7 }
 0x5ec   : > { %4349 = shalt.err (!%p4346_p8)
}
 0x5ed   : > { %3847 = dma.vmem_to_hbm [thread:$0]  (%p5125_p13), %s5005_s18, 1024, %s5003_s0, %s3189_s27  }
 0x5ee PF: > { %s3215_s25 = sand.u32 1, %s4404_s21   ;;  %p5126_p5 = scmp.ne.s32.totalorder %s5102_s20, 0 }
 0x5ef   : > { %p5127_p10 = scmp.ge.s32.totalorder %s4416_s24, 2  ;;  %s3216_s12 = scalar_lea.sflag [#allocation4], %s3215_s25 }
 0x5f1   : > { %p3888_p1 = pnand %p5127_p10, %p5126_p5 }
 0x5f3   : > { %4399 = dma.done.wait (!%p3888_p1), %s3216_s12, 1024  }
 0x5f4   : > { %4401 = vsyncadd (!%p3888_p1), %s3216_s12, 4294966272  ;;  %p33_p11 = scmp.ge.s32.totalorder %s4761_s13, 4   ;;  %s5128_s21 = smov %s4408_s22 }
 0x5f5   : > { %s5129_s22 = smov %s4412_s23  ;;  %s5130_s23 = smov %s4772_s1 }
 0x5f6   : > { %s5131_s24 = smov %s4761_s13  ;;  %35 = sbr.rel (!%p33_p11) target bundleno = 23 (0x17), region = 166 }
 0x5fd   :  { %3221 = vsyncpa [#allocation3], 1 }
 0x5fe   :  { %3223 = vsyncpa [#allocation3 + $0x1], 1 }
 0x5ff   :  { %3224 = vsyncpa [#allocation6], 1 }
 0x600   :  { %3226 = vsyncpa [#allocation6 + $0x1], 1 }
 0x601   :  { %3227 = vsyncpa [#allocation9], 1 }
 0x602   :  { %3228 = vsyncpa [#allocation12], 1 }
 0x603   :  { %3229 = vsyncpa [#allocation15], 1 }
 0x604   :  { %3230 = vsyncpa [#allocation18], 1 }
 0x605   :  { %3231 = vsyncpa [#allocation21], 1 }
 0x606   :  { %3232 = vsyncpa [#allocation4], 1 }
 0x607   :  { %3234 = vsyncpa [#allocation4 + $0x1], 1 }

</bundles_post_ra>
